<compile_context>
chip_gen: v7x
topology: tpu7x:2x2x1
jax: 0.10.0
libtpu: 0.0.40
codegen_flags: <defaults>
</compile_context>

<pallas_src>
import functools

import jax
import jax.numpy as jnp
from jax.experimental import pallas as pl
from jax.experimental.pallas import tpu as pltpu


def _round_up(v, m):
    return ((v + m - 1) // m) * m


def _vmem_limit_bytes():
    cap = 64 * 1024 * 1024          # conservative default (v7x physical VMEM)
    try:
        info = pltpu.get_tpu_info()
        cap = int(getattr(info, "vmem_capacity_bytes", cap))
    except Exception:
        pass
    return (min(cap, 128 * 1024 * 1024) * 3) // 4


def _pick_tile_n(n, d, b_pad, itemsize, vmem_limit):
    """Largest row tile that fits: 2x double-buffered x tiles plus ~1 tile of
    per-tile intermediates (weighted / scores / one-hot), all lane-padded."""
    d_mxu = _round_up(d, 128)
    fixed = (2 * d * d * 4                      # f32 weight (double-buffered)
             + 3 * b_pad * d_mxu * 4            # seg accumulator + out block
             + _round_up(d, 8) * 128 * itemsize # tg^T scratch (lane-padded)
             + 256 * 1024)                      # batch/counts tiles, slack
    avail = max(vmem_limit - fixed, 1 << 20)
    per_row = 3 * d_mxu * itemsize + 3 * 128 * 4
    tile = avail // max(per_row, 1)
    tile = (tile // 128) * 128
    # Cap raised from 2048 -> 8192 so each grid step moves enough bytes to
    # amortize the per-step overhead at v7x HBM bandwidth.
    return int(max(256, min(8192, tile)))


def _graph_att_pool_kernel(batch_ref, counts_ref, x_ref, w_ref, out_ref,
                           seg_ref, tgt_ref, xcache_ref,
                           *, b_pad, n, tile_n, cache_x, ragged):
    phase = pl.program_id(0)
    tile = pl.program_id(1)
    n_tiles = pl.num_programs(1)

    def masked_x():
        x_t = x_ref[...]                                    # [TILE_N, D]
        if ragged:
            # Boundary-block rows past N hold unspecified data; zero them so
            # they cannot contaminate the one-hot matmuls (0 * garbage).
            row = (jax.lax.broadcasted_iota(jnp.int32, (tile_n, 1), 0)
                   + tile * tile_n)
            x_t = jnp.where(row < n, x_t, jnp.zeros_like(x_t))
        return x_t

    def hit_mask():
        gid = jax.lax.broadcasted_iota(jnp.int32, (b_pad, tile_n), 0)
        return gid == batch_ref[...]                        # [B_pad, TILE_N]

    @pl.when(jnp.logical_and(phase == 0, tile == 0))
    def _init():
        seg_ref[...] = jnp.zeros_like(seg_ref)

    @pl.when(phase == 0)
    def _phase0_segment_sum():
        x_t = masked_x()
        if cache_x:
            start = pl.multiple_of(tile * tile_n, 128)
            xcache_ref[pl.ds(start, tile_n), :] = x_t       # reuse in phase 1
        onehot_bn = hit_mask().astype(x_t.dtype)            # [B_pad, TILE_N]
        # Segment sum on the MXU (contraction dim = TILE_N), f32 accumulation.
        seg_ref[...] += jnp.dot(onehot_bn, x_t,
                                preferred_element_type=jnp.float32)

        @pl.when(tile == n_tiles - 1)
        def _finalize_mean():
            counts = counts_ref[...]                        # [B_pad, 1] f32
            mean = seg_ref[...] / jnp.maximum(counts, 1.0)
            tg = jnp.tanh(jnp.dot(mean, w_ref[...],
                                  preferred_element_type=jnp.float32))
            tgt_ref[...] = tg.T.astype(tgt_ref.dtype)       # [D, B_pad], once
            seg_ref[...] = jnp.zeros_like(seg_ref)          # reuse as out acc

    @pl.when(phase == 1)
    def _phase1_weighted_scatter():
        if cache_x:
            start = pl.multiple_of(tile * tile_n, 128)
            x_t = xcache_ref[pl.ds(start, tile_n), :]       # no HBM re-read
        else:
            x_t = masked_x()
        hit = hit_mask()
        onehot_bn = hit.astype(x_t.dtype)                   # [B_pad, TILE_N]
        # Attention scores: K = D contraction on the MXU.
        s = jnp.dot(x_t, tgt_ref[...],
                    preferred_element_type=jnp.float32)     # [TILE_N, B_pad]
        # Per-node score select via a transpose of the one-hot (XLU is idle).
        onehot_nb = hit.astype(jnp.float32).T               # [TILE_N, B_pad]
        sel = jnp.sum(s * onehot_nb, axis=1, keepdims=True) # [TILE_N, 1] f32
        coefs = jax.nn.sigmoid(10.0 * sel)                  # f32 (v5e-friendly)
        weighted = x_t * coefs.astype(x_t.dtype)            # [TILE_N, D]
        seg_ref[...] += jnp.dot(onehot_bn, weighted,
                                preferred_element_type=jnp.float32)

        @pl.when(tile == n_tiles - 1)
        def _store():
            out_ref[...] = seg_ref[...].astype(out_ref.dtype)


def graph_attention_pooling(x, batch, weight, num_graphs, tile_n=None,
                            cache=None):
    """Pallas implementation of GraphAttentionPooling.forward(x, batch, size)."""
    n, d = x.shape
    b_pad = _round_up(max(int(num_graphs), 1), 8)
    itemsize = jnp.dtype(x.dtype).itemsize
    d_mxu = _round_up(d, 128)
    vmem_limit = _vmem_limit_bytes()

    # ---- tile size over N ---------------------------------------------------
    if tile_n is None:
        tile_n = _pick_tile_n(n, d, b_pad, itemsize, vmem_limit)
    else:
        tile_n = max(128, _round_up(int(tile_n), 128))
    if tile_n >= n:
        tile_n, num_tiles, ragged = n, 1, False    # block == full array dim
    else:
        num_tiles = -(-n // tile_n)
        ragged = (n % tile_n) != 0

    # ---- can phase 1 reuse a VMEM-cached copy of x? -------------------------
    fixed_bytes = (2 * d * d * 4 + 3 * b_pad * d_mxu * 4
                   + _round_up(d, 8) * 128 * itemsize + 256 * 1024)
    per_tile_bytes = tile_n * (3 * d_mxu * itemsize + 3 * 128 * 4)
    cache_bytes = num_tiles * tile_n * d_mxu * itemsize
    if cache is None:
        cache_x = (num_tiles > 1 and
                   fixed_bytes + per_tile_bytes + cache_bytes
                   <= (vmem_limit * 17) // 20)
    else:
        cache_x = bool(cache) and num_tiles > 1

    # ---- tiny wrapper-side inputs (no padded copy of x) ---------------------
    batch_i32 = batch.astype(jnp.int32)
    batch_row = batch_i32.reshape(1, n)
    counts = jax.ops.segment_sum(jnp.ones((n,), jnp.float32), batch_i32,
                                 num_segments=b_pad).reshape(b_pad, 1)
    w_f32 = weight.astype(jnp.float32)             # keep f32 for tanh parity

    kernel = functools.partial(
        _graph_att_pool_kernel, b_pad=b_pad, n=n, tile_n=tile_n,
        cache_x=cache_x, ragged=ragged)

    # In cache mode the x block index pins to 0 during phase 1 so Pallas does
    # not re-stream x from HBM for the second pass.
    x_map = (lambda p, j: (j * (1 - p), 0)) if cache_x else (lambda p, j: (j, 0))
    cache_shape = (num_tiles * tile_n, d) if cache_x else (8, 128)

    x_reads = 1 if (cache_x or num_tiles == 1) else 2
    cost = pl.CostEstimate(
        flops=int(4 * n * d * b_pad + 2 * b_pad * d * d),
        transcendentals=int(n + b_pad * d),
        bytes_accessed=int(x_reads * n * d * itemsize + d * d * 4 + 2 * n * 4
                           + b_pad * (d * itemsize + 4)))

    grid = (2, num_tiles)   # (phase, tile over N) -- both sequential reductions
    out = pl.pallas_call(
        kernel,
        out_shape=jax.ShapeDtypeStruct((b_pad, d), x.dtype),
        grid_spec=pltpu.PrefetchScalarGridSpec(
            num_scalar_prefetch=0,
            grid=grid,
            in_specs=[
                pl.BlockSpec((1, tile_n), lambda p, j: (0, j)),   # batch ids
                pl.BlockSpec((b_pad, 1), lambda p, j: (0, 0)),    # node counts
                pl.BlockSpec((tile_n, d), x_map),                 # x tiles
                pl.BlockSpec((d, d), lambda p, j: (0, 0)),        # weight
            ],
            out_specs=pl.BlockSpec((b_pad, d), lambda p, j: (0, 0)),
            scratch_shapes=[
                pltpu.VMEM((b_pad, d), jnp.float32),   # seg-sum, then out acc
                pltpu.VMEM((d, b_pad), x.dtype),       # tg^T (stored in x dtype)
                pltpu.VMEM(cache_shape, x.dtype),      # cached x (or dummy)
            ],
        ),
        compiler_params=pltpu.CompilerParams(
            # TODO(synk): v7x dual-TensorCore split of the N range.
            dimension_semantics=("arbitrary", "arbitrary"),
            vmem_limit_bytes=vmem_limit,
        ),
        cost_estimate=cost,
    )(batch_row, counts, x, w_f32)
    return out[:num_graphs, :]


class GraphPooling:
    """JAX/Pallas port of GraphPooling with aggr='attention'."""

    def __init__(self, output_dim, key):
        # Deterministic orthogonal init (mirrors nn.init.orthogonal_).
        a = jax.random.normal(key, (output_dim, output_dim), dtype=jnp.float32)
        q, r = jnp.linalg.qr(a)
        q = q * jnp.sign(jnp.diag(r))[None, :]
        self.weight = q.astype(jnp.float32)     # [D, D]
        self.output_dim = output_dim

    def __call__(self, x, batch, size=None, tile_n=None, cache=None):
        if size is None:
            # Mirrors PyTorch's `batch[-1].item() + 1`; forces a host sync, so
            # pass `size` explicitly when calling under jit.
            size = int(jnp.max(batch)) + 1
        return graph_attention_pooling(x, batch, self.weight, size,
                                       tile_n=tile_n, cache=cache)


def _reference(x, batch, weight, num_graphs):
    """Pure-JAX reference matching the PyTorch forward."""
    seg_sum = jax.ops.segment_sum(x, batch, num_segments=num_graphs)
    counts = jax.ops.segment_sum(jnp.ones((x.shape[0],), x.dtype), batch,
                                 num_segments=num_graphs)
    mean = seg_sum / jnp.maximum(counts, 1.0)[:, None]
    tg = jnp.tanh(mean @ weight)
    coefs = jax.nn.sigmoid(jnp.sum(x * tg[batch] * 10.0, axis=1))
    weighted = coefs[:, None] * x
    return jax.ops.segment_sum(weighted, batch, num_segments=num_graphs)


if __name__ == "__main__":
    key = jax.random.PRNGKey(0)
    kx, kw = jax.random.split(key)

    N, D, B = 400, 32, 4        # nodes, feature dim, graphs (D not 128-aligned)
    x = jax.random.normal(kx, (N, D), dtype=jnp.float32)
    # Equal-size graphs, sorted batch vector (as produced by PyG dataloaders).
    batch = jnp.repeat(jnp.arange(B, dtype=jnp.int32), N // B)

    pool = GraphPooling(output_dim=D, key=kw)
    ref = _reference(x, batch, pool.weight, B)

    # 1) auto config: single tile, x resident in VMEM (single HBM read).
    out_auto = jax.block_until_ready(pool(x, batch, size=B))
    # 2) forced multi-tile grid (ragged last tile) with VMEM-cached phase 1.
    out_cached = jax.block_until_ready(pool(x, batch, size=B, tile_n=128))
    # 3) forced multi-tile grid, pure streaming (x read twice from HBM).
    out_stream = jax.block_until_ready(
        pool(x, batch, size=B, tile_n=128, cache=False))

    for out in (out_auto, out_cached, out_stream):
        assert out.shape == (B, D)
        assert jnp.allclose(out, ref, atol=1e-4, rtol=1e-4), "mismatch vs ref"

    print("KERNEL_OK")
</pallas_src>

<mosaic_0001>
module attributes {stable_mosaic.version = 11 : i64} {
  func.func @_graph_att_pool_kernel(%arg0: i32, %arg1: i32, %arg2: memref<1x400xi32, #tpu.memory_space<vmem>>, %arg3: memref<8x1xf32, #tpu.memory_space<vmem>>, %arg4: memref<400x32xf32, #tpu.memory_space<vmem>>, %arg5: memref<32x32xf32, #tpu.memory_space<vmem>>, %arg6: memref<8x32xf32, #tpu.memory_space<vmem>>, %arg7: memref<8x32xf32, #tpu.memory_space<vmem>>, %arg8: memref<32x8xf32, #tpu.memory_space<vmem>>, %arg9: memref<8x128xf32, #tpu.memory_space<vmem>>) attributes {dimension_semantics = [#tpu.dimension_semantics<arbitrary>, #tpu.dimension_semantics<arbitrary>], iteration_bounds = array<i64: 2, 1>, scalar_prefetch = 0 : i64, scratch_operands = 3 : i64, tpu.core_type = #tpu.core_type<tc>, window_params = [{transform_indices = @transform_0, window_bounds = array<i64: 1, 400>}, {pipeline_mode = #tpu.pipeline_mode<synchronous>, transform_indices = @transform_1, window_bounds = array<i64: 8, 1>}, {transform_indices = @transform_2, window_bounds = array<i64: 400, 32>}, {pipeline_mode = #tpu.pipeline_mode<synchronous>, transform_indices = @transform_3, window_bounds = array<i64: 32, 32>}, {pipeline_mode = #tpu.pipeline_mode<synchronous>, transform_indices = @transform_4, window_bounds = array<i64: 8, 32>}]} {
    %c0_i32 = arith.constant 0 : i32
    %0 = arith.cmpi eq, %arg0, %c0_i32 : i32
    %c0_i32_0 = arith.constant 0 : i32
    %1 = arith.cmpi eq, %arg1, %c0_i32_0 : i32
    %2 = arith.andi %0, %1 : i1
    %3 = arith.extui %2 : i1 to i32
    %c0_i32_1 = arith.constant 0 : i32
    %4 = arith.cmpi ne, %3, %c0_i32_1 : i32
    scf.if %4 {
      %cst = arith.constant 0.000000e+00 : f32
      %11 = vector.broadcast %cst : f32 to vector<8x32xf32>
      %c0 = arith.constant 0 : index
      %c0_5 = arith.constant 0 : index
      %12 = vector.load %arg7[%c0, %c0_5] : memref<8x32xf32, #tpu.memory_space<vmem>>, vector<8x32xf32>
      tpu.vector_store %arg7[%c0, %c0_5], %11 {strides = array<i32>} : memref<8x32xf32, #tpu.memory_space<vmem>>, vector<8x32xf32>,
    } else {
    }
    %c0_i32_2 = arith.constant 0 : i32
    %5 = arith.cmpi eq, %arg0, %c0_i32_2 : i32
    %6 = arith.extui %5 : i1 to i32
    %c0_i32_3 = arith.constant 0 : i32
    %7 = arith.cmpi ne, %6, %c0_i32_3 : i32
    scf.if %7 {
      %c0 = arith.constant 0 : index
      %c0_5 = arith.constant 0 : index
      %11 = vector.load %arg4[%c0, %c0_5] : memref<400x32xf32, #tpu.memory_space<vmem>>, vector<400x32xf32>
      %12 = tpu.iota {dimensions = array<i32: 0>} : vector<8x400xi32>
      %c0_6 = arith.constant 0 : index
      %c0_7 = arith.constant 0 : index
      %13 = vector.load %arg2[%c0_6, %c0_7] : memref<1x400xi32, #tpu.memory_space<vmem>>, vector<1x400xi32>
      %14 = vector.broadcast %13 : vector<1x400xi32> to vector<8x400xi32>
      %15 = arith.cmpi eq, %12, %14 : vector<8x400xi32>
      %16 = arith.extui %15 : vector<8x400xi1> to vector<8x400xi32>
      %17 = arith.sitofp %16 : vector<8x400xi32> to vector<8x400xf32>
      %c0_8 = arith.constant 0 : index
      %c0_9 = arith.constant 0 : index
      %18 = vector.load %arg7[%c0_8, %c0_9] : memref<8x32xf32, #tpu.memory_space<vmem>>, vector<8x32xf32>
      %cst = arith.constant dense<0.000000e+00> : vector<8x32xf32>
      %19 = tpu.matmul %17, %11, %cst {dimension_numbers = #tpu.dot_dimension_numbers<[1], [0], [0], [1], [0, 0, 1, 1], [], []>} : vector<8x400xf32>, vector<400x32xf32>, vector<8x32xf32> -> vector<8x32xf32>
      %20 = arith.addf %18, %19 : vector<8x32xf32>
      %c0_10 = arith.constant 0 : index
      %c0_11 = arith.constant 0 : index
      %21 = vector.load %arg7[%c0_10, %c0_11] : memref<8x32xf32, #tpu.memory_space<vmem>>, vector<8x32xf32>
      tpu.vector_store %arg7[%c0_10, %c0_11], %20 {strides = array<i32>} : memref<8x32xf32, #tpu.memory_space<vmem>>, vector<8x32xf32>,
      %c0_i32_12 = arith.constant 0 : i32
      %22 = arith.cmpi eq, %arg1, %c0_i32_12 : i32
      %23 = arith.extui %22 : i1 to i32
      %c0_i32_13 = arith.constant 0 : i32
      %24 = arith.cmpi ne, %23, %c0_i32_13 : i32
      scf.if %24 {
        %c0_14 = arith.constant 0 : index
        %c0_15 = arith.constant 0 : index
        %25 = vector.load %arg3[%c0_14, %c0_15] : memref<8x1xf32, #tpu.memory_space<vmem>>, vector<8x1xf32>
        %c0_16 = arith.constant 0 : index
        %c0_17 = arith.constant 0 : index
        %26 = vector.load %arg7[%c0_16, %c0_17] : memref<8x32xf32, #tpu.memory_space<vmem>>, vector<8x32xf32>
        %cst_18 = arith.constant 1.000000e+00 : f32
        %27 = vector.broadcast %cst_18 : f32 to vector<8x1xf32>
        %28 = arith.maximumf %25, %27 : vector<8x1xf32>
        %29 = vector.broadcast %28 : vector<8x1xf32> to vector<8x32xf32>
        %30 = arith.divf %26, %29 : vector<8x32xf32>
        %c0_19 = arith.constant 0 : index
        %c0_20 = arith.constant 0 : index
        %31 = vector.load %arg5[%c0_19, %c0_20] : memref<32x32xf32, #tpu.memory_space<vmem>>, vector<32x32xf32>
        %cst_21 = arith.constant dense<0.000000e+00> : vector<8x32xf32>
        %32 = tpu.matmul %30, %31, %cst_21 {dimension_numbers = #tpu.dot_dimension_numbers<[1], [0], [0], [1], [0, 0, 1, 1], [], []>} : vector<8x32xf32>, vector<32x32xf32>, vector<8x32xf32> -> vector<8x32xf32>
        %33 = math.tanh %32 : vector<8x32xf32>
        %34 = tpu.transpose %33, [1, 0] : vector<8x32xf32> -> vector<32x8xf32>
        %c0_22 = arith.constant 0 : index
        %c0_23 = arith.constant 0 : index
        %35 = vector.load %arg8[%c0_22, %c0_23] : memref<32x8xf32, #tpu.memory_space<vmem>>, vector<32x8xf32>
        tpu.vector_store %arg8[%c0_22, %c0_23], %34 {strides = array<i32>} : memref<32x8xf32, #tpu.memory_space<vmem>>, vector<32x8xf32>,
        %cst_24 = arith.constant 0.000000e+00 : f32
        %36 = vector.broadcast %cst_24 : f32 to vector<8x32xf32>
        %c0_25 = arith.constant 0 : index
        %c0_26 = arith.constant 0 : index
        %37 = vector.load %arg7[%c0_25, %c0_26] : memref<8x32xf32, #tpu.memory_space<vmem>>, vector<8x32xf32>
        tpu.vector_store %arg7[%c0_25, %c0_26], %36 {strides = array<i32>} : memref<8x32xf32, #tpu.memory_space<vmem>>, vector<8x32xf32>,
      } else {
      }
    } else {
    }
    %c1_i32 = arith.constant 1 : i32
    %8 = arith.cmpi eq, %arg0, %c1_i32 : i32
    %9 = arith.extui %8 : i1 to i32
    %c0_i32_4 = arith.constant 0 : i32
    %10 = arith.cmpi ne, %9, %c0_i32_4 : i32
    scf.if %10 {
      %c0 = arith.constant 0 : index
      %c0_5 = arith.constant 0 : index
      %11 = vector.load %arg4[%c0, %c0_5] : memref<400x32xf32, #tpu.memory_space<vmem>>, vector<400x32xf32>
      %12 = tpu.iota {dimensions = array<i32: 0>} : vector<8x400xi32>
      %c0_6 = arith.constant 0 : index
      %c0_7 = arith.constant 0 : index
      %13 = vector.load %arg2[%c0_6, %c0_7] : memref<1x400xi32, #tpu.memory_space<vmem>>, vector<1x400xi32>
      %14 = vector.broadcast %13 : vector<1x400xi32> to vector<8x400xi32>
      %15 = arith.cmpi eq, %12, %14 : vector<8x400xi32>
      %16 = arith.extui %15 : vector<8x400xi1> to vector<8x400xi32>
      %17 = arith.sitofp %16 : vector<8x400xi32> to vector<8x400xf32>
      %c0_8 = arith.constant 0 : index
      %c0_9 = arith.constant 0 : index
      %18 = vector.load %arg8[%c0_8, %c0_9] : memref<32x8xf32, #tpu.memory_space<vmem>>, vector<32x8xf32>
      %cst = arith.constant dense<0.000000e+00> : vector<400x8xf32>
      %19 = tpu.matmul %11, %18, %cst {dimension_numbers = #tpu.dot_dimension_numbers<[1], [0], [0], [1], [0, 0, 1, 1], [], []>} : vector<400x32xf32>, vector<32x8xf32>, vector<400x8xf32> -> vector<400x8xf32>
      %20 = arith.extui %15 : vector<8x400xi1> to vector<8x400xi32>
      %21 = arith.sitofp %20 : vector<8x400xi32> to vector<8x400xf32>
      %22 = tpu.transpose %21, [1, 0] : vector<8x400xf32> -> vector<400x8xf32>
      %23 = arith.mulf %19, %22 : vector<400x8xf32>
      %cst_10 = arith.constant dense<0.000000e+00> : vector<400xf32>
      %24 = vector.multi_reduction <add>, %23, %cst_10 [1] : vector<400x8xf32> to vector<400xf32>
      %25 = vector.shape_cast %24 : vector<400xf32> to vector<400x1xf32>
      %cst_11 = arith.constant 1.000000e+01 : f32
      %26 = vector.broadcast %cst_11 : f32 to vector<400x1xf32>
      %27 = arith.mulf %26, %25 : vector<400x1xf32>
      %28 = arith.negf %27 : vector<400x1xf32>
      %29 = math.exp %28 : vector<400x1xf32>
      %cst_12 = arith.constant 1.000000e+00 : f32
      %30 = vector.broadcast %cst_12 : f32 to vector<400x1xf32>
      %31 = arith.addf %30, %29 : vector<400x1xf32>
      %32 = arith.divf %30, %31 : vector<400x1xf32>
      %33 = vector.broadcast %32 : vector<400x1xf32> to vector<400x32xf32>
      %34 = arith.mulf %11, %33 : vector<400x32xf32>
      %c0_13 = arith.constant 0 : index
      %c0_14 = arith.constant 0 : index
      %35 = vector.load %arg7[%c0_13, %c0_14] : memref<8x32xf32, #tpu.memory_space<vmem>>, vector<8x32xf32>
      %cst_15 = arith.constant dense<0.000000e+00> : vector<8x32xf32>
      %36 = tpu.matmul %17, %34, %cst_15 {dimension_numbers = #tpu.dot_dimension_numbers<[1], [0], [0], [1], [0, 0, 1, 1], [], []>} : vector<8x400xf32>, vector<400x32xf32>, vector<8x32xf32> -> vector<8x32xf32>
      %37 = arith.addf %35, %36 : vector<8x32xf32>
      %c0_16 = arith.constant 0 : index
      %c0_17 = arith.constant 0 : index
      %38 = vector.load %arg7[%c0_16, %c0_17] : memref<8x32xf32, #tpu.memory_space<vmem>>, vector<8x32xf32>
      tpu.vector_store %arg7[%c0_16, %c0_17], %37 {strides = array<i32>} : memref<8x32xf32, #tpu.memory_space<vmem>>, vector<8x32xf32>,
      %c0_i32_18 = arith.constant 0 : i32
      %39 = arith.cmpi eq, %arg1, %c0_i32_18 : i32
      %40 = arith.extui %39 : i1 to i32
      %c0_i32_19 = arith.constant 0 : i32
      %41 = arith.cmpi ne, %40, %c0_i32_19 : i32
      scf.if %41 {
        %c0_20 = arith.constant 0 : index
        %c0_21 = arith.constant 0 : index
        %42 = vector.load %arg7[%c0_20, %c0_21] : memref<8x32xf32, #tpu.memory_space<vmem>>, vector<8x32xf32>
        %c0_22 = arith.constant 0 : index
        %c0_23 = arith.constant 0 : index
        %43 = vector.load %arg6[%c0_22, %c0_23] : memref<8x32xf32, #tpu.memory_space<vmem>>, vector<8x32xf32>
        tpu.vector_store %arg6[%c0_22, %c0_23], %42 {strides = array<i32>} : memref<8x32xf32, #tpu.memory_space<vmem>>, vector<8x32xf32>,
      } else {
      }
    } else {
    }
    return
  }
  func.func @transform_0(%arg0: i32, %arg1: i32) -> (i32, i32) {
    %c0_i32 = arith.constant 0 : i32
    %c0_i32_0 = arith.constant 0 : i32
    return %c0_i32, %arg1 : i32, i32
  }
  func.func @transform_1(%arg0: i32, %arg1: i32) -> (i32, i32) {
    %c0_i32 = arith.constant 0 : i32
    %c0_i32_0 = arith.constant 0 : i32
    %c0_i32_1 = arith.constant 0 : i32
    return %c0_i32, %c0_i32_0 : i32, i32
  }
  func.func @transform_2(%arg0: i32, %arg1: i32) -> (i32, i32) {
    %c0_i32 = arith.constant 0 : i32
    %c0_i32_0 = arith.constant 0 : i32
    return %arg1, %c0_i32 : i32, i32
  }
  func.func @transform_3(%arg0: i32, %arg1: i32) -> (i32, i32) {
    %c0_i32 = arith.constant 0 : i32
    %c0_i32_0 = arith.constant 0 : i32
    %c0_i32_1 = arith.constant 0 : i32
    return %c0_i32, %c0_i32_0 : i32, i32
  }
  func.func @transform_4(%arg0: i32, %arg1: i32) -> (i32, i32) {
    %c0_i32 = arith.constant 0 : i32
    %c0_i32_0 = arith.constant 0 : i32
    %c0_i32_1 = arith.constant 0 : i32
    return %c0_i32, %c0_i32_0 : i32, i32
  }
}

</mosaic_0001>

<bundles_post_ra>
// kernel: tpu_custom_call.1
= control target key start
LH: loop header
LB: loop body
LE: loop exit
PB: predicated region body
PF: predicated region fallthrough
CT: control target
= control target key end

     0   :  { %9 = vsyncpa [#allocation6], 0  ;;  %s3043_s15 = smov 0   ;;  %s3045_s16 = smov 0   ;;  %s3948_s0 = inlined_call_operand.vmem [shape: s32[1,400], index: 0, kind: input, shape index: {}]   ;;  %s3949_s1 = inlined_call_operand.vmem [shape: f32[8,1], index: 1, kind: input, shape index: {}]   ;;  %s3950_s2 = inlined_call_operand.vmem [shape: f32[400,32], index: 2, kind: input, shape index: {}]   ;;  %s3951_s3 = inlined_call_operand.vmem [shape: f32[32,32], index: 3, kind: input, shape index: {}]   ;;  %s3952_s4 = inlined_call_operand.hbm [shape: f32[8,32], index: 4, kind: output, shape index: {}]  }
   0x1   :  { %s3047_s17 = smov 0  }
   0x2 LB: > { %s2092_s18 = sadd.s32 4294967295, %s3006_s17   ;;  %s27_s19 = sadd.s32 1, %s3002_s16  ;;  %s3006_s17 = sphi %s3047_s17, %s15_s17   ;;  %s3002_s16 = sphi %s3045_s16, %s3955_s16   ;;  %s2998_s15 = sphi %s3043_s15, %s3954_s15  }
   0x3   : > { %p29_p0 = scmp.ge.s32.totalorder %s27_s19, 2  ;;  %p2096_p1 = scmp.ge.s32.totalorder %s3006_s17, 1 }
   0x4   : > { %p181_p2 = scmp.lt.s32.totalorder %s3006_s17, 3 }
   0x5   : > { %s3957_s19 = smov (%p29_p0, %s27_s19), 0 }
   0x6   : > { %p182_p3 = pnand %p2096_p1, %p181_p2 }
   0x7   : > { %p217_p4 = scmp.eq.s32.totalorder (!%p182_p3), %s2998_s15, 0 }
   0x8   : > { %185 = sbr.rel (%p182_p3) target bundleno = 1448 (0x5a8), region = 36 }
   0xf   : > { %222 = sbr.rel (!%p217_p4) target bundleno = 22 (0x16), region = 40  ;;  %vm223_vm0 = vcmask (%p217_p4), 261120   ;;  %v3008_v0 = vmov (%p217_p4), 0.0  }
  0x10   : > { %224 = vst.msk [vmem:[#allocation2] sm:$0xff] (%p217_p4), %vm223_vm0, %v3008_v0 }
  0x16 PF: > { %p2098_p5 = scmp.ne.s32.totalorder %s2998_s15, 0 }
  0x17   : > { %v244_v1 = vld [vmem:[%s3950_s2 + $0x80] sm:$0xff] (!%p2098_p5)  ;;  %v245_v2 = vld [vmem:[%s3950_s2 + $0x88] sm:$0xff] (!%p2098_p5)  ;;  %v3009_v4 = vmov (!%p2098_p5), 0.0|0.0   ;;  %v246_v11 = vld [vmem:[%s3950_s2 + $0x90] sm:$0xff] (!%p2098_p5)  ;;  %v3010_v14 = vmov (!%p2098_p5), 0   ;;  %v278_v28 = vlaneseq (!%p2098_p5)  ;;  %vm310_vm2 = vcmask (!%p2098_p5), 130048  }
  0x18   : > { %227 = sbr.rel (%p2098_p5) target bundleno = 653 (0x28d), region = 44  ;;  %v260_v3 = vld [vmem:[%s3950_s2 + $0x100] sm:$0xff] (!%p2098_p5)  ;;  %2477 = vmatprep.subr.bf16.mxu1 (!%p2098_p5), %v3009_v4  ;;  %v2445_v5 = vpack.c.bf16 (!%p2098_p5), %v245_v2, %v244_v1  ;;  %v261_v6 = vld [vmem:[%s3950_s2 + $0x108] sm:$0xff] (!%p2098_p5)  ;;  %v247_v12 = vld [vmem:[%s3950_s2 + $0x98] sm:$0xff] (!%p2098_p5)  ;;  %2617 = vset.pattern.permute.xlu0 (!%p2098_p5), %v3010_v14  ;;  %v3012_v14 = vmov (!%p2098_p5), 1.0   ;;  %vm3013_vm6 = vmmov (!%p2098_p5), 0  }
  0x19   : > { %v228_v7 = vld [vmem:[%s3950_s2] sm:$0xff] (!%p2098_p5)  ;;  %v229_v8 = vld [vmem:[%s3950_s2 + $0x8] sm:$0xff] (!%p2098_p5)  ;;  %v2478_v9 = vpack.c.bf16 (!%p2098_p5), %v261_v6, %v260_v3  ;;  %v262_v13 = vld [vmem:[%s3950_s2 + $0x110] sm:$0xff] (!%p2098_p5)  ;;  %v2449_v15 = vpack.c.bf16 (!%p2098_p5), %v247_v12, %v246_v11  ;;  %v3141_v38 = vshrl.u32 (!%p2098_p5), %v278_v28, 7  ;;  %vm455_vm7 = vcmask (!%p2098_p5), 261120  }
  0x1a   : > { %v2447_v10 = vpack.c.bf16 (!%p2098_p5), %v229_v8, %v228_v7  ;;  %2446 = vmatprep.subr.bf16.mxu0 (!%p2098_p5), %v2445_v5  ;;  %v263_v16 = vld [vmem:[%s3950_s2 + $0x118] sm:$0xff] (!%p2098_p5)  ;;  %v230_v17 = vld [vmem:[%s3950_s2 + $0x10] sm:$0xff] (!%p2098_p5)  ;;  %v248_v21 = vld [vmem:[%s3950_s2 + $0xa0] sm:$0xff] (!%p2098_p5)  ;;  %vm580_vm8 = vcmask (!%p2098_p5), 64512  }
  0x1b   : > { %v231_v18 = vld [vmem:[%s3950_s2 + $0x18] sm:$0xff] (!%p2098_p5)  ;;  %2479 = vmatpush1.bf16.msra.mxu1 (!%p2098_p5), %v2478_v9  ;;  %v2481_v19 = vpack.c.bf16 (!%p2098_p5), %v263_v16, %v262_v13  ;;  %v249_v22 = vld [vmem:[%s3950_s2 + $0xa8] sm:$0xff] (!%p2098_p5)  ;;  %v264_v23 = vld [vmem:[%s3950_s2 + $0x120] sm:$0xff] (!%p2098_p5)  ;;  %v287_v48 = vsub.s32 (!%p2098_p5), 1, %v3141_v38  ;;  %v295_v51 = vsub.s32 (!%p2098_p5), 3, %v3141_v38 }
  0x1c   : > { %2448 = vmatpush3.bf16.msra.mxu0 (!%p2098_p5), %v2447_v10  ;;  %v2451_v20 = vpack.c.bf16 (!%p2098_p5), %v231_v18, %v230_v17  ;;  %2480 = vmatprep.subr.bf16.mxu1 (!%p2098_p5), %v3009_v4  ;;  %v2453_v24 = vpack.c.bf16 (!%p2098_p5), %v249_v22, %v248_v21  ;;  %v265_v25 = vld [vmem:[%s3950_s2 + $0x128] sm:$0xff] (!%p2098_p5)  ;;  %v232_v26 = vld [vmem:[%s3950_s2 + $0x20] sm:$0xff] (!%p2098_p5)  ;;  %v250_v29 = vld [vmem:[%s3950_s2 + $0xb0] sm:$0xff] (!%p2098_p5)  ;;  %v3011_v10 = vmov (!%p2098_p5), 0.0   ;;  %v283_v18 = vsub.s32 (!%p2098_p5), 0, %v3141_v38 }
  0x1d   : > { %2450 = vmatprep.subr.bf16.mxu0 (!%p2098_p5), %v2449_v15  ;;  %v233_v27 = vld [vmem:[%s3950_s2 + $0x28] sm:$0xff] (!%p2098_p5)  ;;  %v251_v30 = vld [vmem:[%s3950_s2 + $0xb8] sm:$0xff] (!%p2098_p5)  ;;  %v2484_v31 = vpack.c.bf16 (!%p2098_p5), %v265_v25, %v264_v23  ;;  %v266_v33 = vld [vmem:[%s3950_s2 + $0x130] sm:$0xff] (!%p2098_p5) }
  0x1e   : > { %v2455_v32 = vpack.c.bf16 (!%p2098_p5), %v233_v27, %v232_v26  ;;  %v2457_v34 = vpack.c.bf16 (!%p2098_p5), %v251_v30, %v250_v29  ;;  %v267_v35 = vld [vmem:[%s3950_s2 + $0x138] sm:$0xff] (!%p2098_p5)  ;;  %v234_v36 = vld [vmem:[%s3950_s2 + $0x30] sm:$0xff] (!%p2098_p5)  ;;  %v252_v39 = vld [vmem:[%s3950_s2 + $0xc0] sm:$0xff] (!%p2098_p5)  ;;  %v291_v26 = vsub.s32 (!%p2098_p5), 2, %v3141_v38 }
  0x1f   : > { %2482 = vmatpush1.bf16.msra.mxu1 %v2481_v19  ;;  %v235_v37 = vld [vmem:[%s3950_s2 + $0x38] sm:$0xff]  ;;  %v253_v40 = vld [vmem:[%s3950_s2 + $0xc8] sm:$0xff]  ;;  %v2487_v41 = vpack.c.bf16 %v267_v35, %v266_v33  ;;  %v268_v43 = vld [vmem:[%s3950_s2 + $0x140] sm:$0xff] }
  0x20   : > { %2452 = vmatpush3.bf16.msra.mxu0 %v2451_v20  ;;  %2483 = vmatprep.subr.bf16.mxu1 %v3009_v4  ;;  %v2459_v42 = vpack.c.bf16 %v235_v37, %v234_v36  ;;  %v2461_v44 = vpack.c.bf16 %v253_v40, %v252_v39  ;;  %v269_v45 = vld [vmem:[%s3950_s2 + $0x148] sm:$0xff]  ;;  %v236_v46 = vld [vmem:[%s3950_s2 + $0x40] sm:$0xff]  ;;  %v254_v49 = vld [vmem:[%s3950_s2 + $0xd0] sm:$0xff] }
  0x21   : > { %2454 = vmatprep.subr.bf16.mxu0 %v2453_v24  ;;  %v237_v47 = vld [vmem:[%s3950_s2 + $0x48] sm:$0xff]  ;;  %v255_v50 = vld [vmem:[%s3950_s2 + $0xd8] sm:$0xff]  ;;  %v2490_v52 = vpack.c.bf16 %v269_v45, %v268_v43  ;;  %v270_v54 = vld [vmem:[%s3950_s2 + $0x150] sm:$0xff] }
  0x22   : > { %v2463_v53 = vpack.c.bf16 %v237_v47, %v236_v46  ;;  %v271_v55 = vld [vmem:[%s3950_s2 + $0x158] sm:$0xff]  ;;  %v280_v56 = vld [vmem:[%s3948_s0] sm:$0xf]  ;;  %v2465_v57 = vpack.c.bf16 %v255_v50, %v254_v49  ;;  %v238_v58 = vld [vmem:[%s3950_s2 + $0x50] sm:$0xff] }
  0x23   : > { %2485 = vmatpush1.bf16.msra.mxu1 %v2484_v31  ;;  %v239_v59 = vld [vmem:[%s3950_s2 + $0x58] sm:$0xff]  ;;  %v288_v60 = vrot.slane %v280_v56, %v287_v48  ;;  %v460_v61 = vld [vmem:[%s3949_s1] sm:$0xff]  ;;  %v257_v63 = vld [vmem:[%s3950_s2 + $0xe8] sm:$0xff]  ;;  %v296_v0 = vrot.slane %v280_v56, %v295_v51  ;;  %v2493_v2 = vpack.c.bf16 %v271_v55, %v270_v54  ;;  %v284_v25 = vrot.slane %v280_v56, %v283_v18 }
  0x24   : > { %2456 = vmatpush3.bf16.msra.mxu0 %v2455_v32  ;;  %2486 = vmatprep.subr.bf16.mxu1 %v3009_v4  ;;  %v256_v62 = vld [vmem:[%s3950_s2 + $0xe0] sm:$0xff]  ;;  %v462_v1 = vmax.f32 %v460_v61, 1.0  ;;  %v2467_v3 = vpack.c.bf16 %v239_v59, %v238_v58  ;;  %v273_v7 = vld [vmem:[%s3950_s2 + $0x168] sm:$0xff]  ;;  %v258_v12 = vld [vmem:[%s3950_s2 + $0xf0] sm:$0xff]  ;;  %v292_v30 = vrot.slane %v280_v56, %v291_v26 }
  0x25   : > { %2458 = vmatprep.subr.bf16.mxu0 %v2457_v34  ;;  %vm298_vm1 = vcmp.eq.s32.totalorder %v3141_v38, %v288_v60  ;;  %v272_v5 = vld [vmem:[%s3950_s2 + $0x160] sm:$0xff]  ;;  %vm300_vm3 = vcmp.eq.s32.totalorder %v3141_v38, %v296_v0  ;;  %v2469_v6 = vpack.c.bf16 %v257_v63, %v256_v62  ;;  %v241_v9 = vld [vmem:[%s3950_s2 + $0x68] sm:$0xff]  ;;  %v259_v13 = vld [vmem:[%s3950_s2 + $0xf8] sm:$0xff]  ;;  %vm297_vm4 = vcmp.eq.s32.totalorder %v3141_v38, %v284_v25 }
  0x26   : > { %v240_v8 = vld [vmem:[%s3950_s2 + $0x60] sm:$0xff]  ;;  %v2102_v11 = vsel %vm300_vm3, 1.0, %v3011_v10  ;;  %2103 = vmatprep.mubr.msk.f32.mxu0 %vm298_vm1, %v3012_v14  ;;  %465 = vperm.xlu0 %2617, %v462_v1   ;;  %v2496_v15 = vpack.c.bf16 %v273_v7, %v272_v5  ;;  %v274_v17 = vld [vmem:[%s3950_s2 + $0x170] sm:$0xff]  ;;  %v2473_v19 = vpack.c.bf16 %v259_v13, %v258_v12  ;;  %v275_v20 = vld [vmem:[%s3950_s2 + $0x178] sm:$0xff]  ;;  %vm299_vm5 = vcmp.eq.s32.totalorder %v3141_v38, %v292_v30 }
  0x27   : > { %2488 = vmatpush1.bf16.msra.mxu1 %v2487_v41  ;;  %2105 = vmatprep.mubr.msk.f32.mxu1 %vm310_vm2, %v2102_v11  ;;  %v2471_v16 = vpack.c.bf16 %v241_v9, %v240_v8  ;;  %v242_v21 = vld [vmem:[%s3950_s2 + $0x70] sm:$0xff]  ;;  %v243_v22 = vld [vmem:[%s3950_s2 + $0x78] sm:$0xff]  ;;  %v2499_v23 = vpack.c.bf16 %v275_v20, %v274_v17  ;;  %v276_v27 = vld [vmem:[%s3950_s2 + $0x180] sm:$0xff] }
  0x28   : > { %2460 = vmatpush3.bf16.msra.mxu0 %v2459_v42  ;;  %2489 = vmatprep.subr.bf16.mxu1 %v3009_v4  ;;  %v2475_v24 = vpack.c.bf16 %v243_v22, %v242_v21  ;;  %v277_v28 = vld [vmem:[%s3950_s2 + $0x188] sm:$0xff]  ;;  %v470_v31 = vld [vmem:[%s3951_s3] sm:$0xff]  ;;  %v472_v34 = vld [vmem:[%s3951_s3 + $0x10] sm:$0xff] }
  0x29   : > { %2462 = vmatprep.subr.bf16.mxu0 %v2461_v44  ;;  %v2502_v29 = vpack.c.bf16 %v277_v28, %v276_v27  ;;  %v471_v32 = vld [vmem:[%s3951_s3 + $0x8] sm:$0xff]  ;;  %v473_v35 = vld [vmem:[%s3951_s3 + $0x18] sm:$0xff]  ;;  %v309_v41 = vld [vmem:[#allocation2] sm:$0xff] }
  0x2a   : > { %v2505_v33 = vpack.c.bf16 %v471_v32, %v470_v31  ;;  %v2508_v36 = vpack.c.bf16 %v473_v35, %v472_v34 }
  0x2b   : > { %2491 = vmatpush1.bf16.msra.mxu1 %v2490_v52 }
  0x2c   : > { %2464 = vmatpush3.bf16.msra.mxu0 %v2463_v53  ;;  %2492 = vmatprep.subr.bf16.mxu1 %v3009_v4 }
  0x2d   : > { %2466 = vmatprep.subr.bf16.mxu0 %v2465_v57 }
  0x2f   : > { %2494 = vmatpush1.bf16.msra.mxu1 %v2493_v2 }
  0x30   : > { %2468 = vmatpush3.bf16.msra.mxu0 %v2467_v3  ;;  %2495 = vmatprep.subr.bf16.mxu1 %v3009_v4 }
  0x31   : > { %2470 = vmatprep.subr.bf16.mxu0 %v2469_v6 }
  0x33   : > { %2497 = vmatpush1.bf16.msra.mxu1 %v2496_v15 }
  0x34   : > { %2472 = vmatpush3.bf16.msra.mxu0 %v2471_v16  ;;  %2498 = vmatprep.subr.bf16.mxu1 %v3009_v4 }
  0x35   : > { %2474 = vmatprep.subr.bf16.mxu0 %v2473_v19 }
  0x37   : > { %2500 = vmatpush1.bf16.msra.mxu1 %v2499_v23 }
  0x38   : > { %2476 = vmatpush3.bf16.msra.mxu0 %v2475_v24  ;;  %2501 = vmatprep.subr.bf16.mxu1 %v3009_v4 }
  0x39   : > { %2504 = vmatprep.subr.bf16.mxu0 %v3009_v4 }
  0x3b   : > { %2104 = vmatmul.mubr.msk.f32.vlgmr.msra.gmra.mrb[0].mxu0 %vm297_vm4, %v3012_v14  ;;  %2503 = vmatpush1.bf16.msra.mxu1 %v2502_v29 }
  0x3c   : > { %2506 = vmatpush3.bf16.msra.mxu0 %v2505_v33  ;;  %2359 = vmatprep.mubr.msk.f32.mxu0 %vm3013_vm6, %v3011_v10 }
  0x3d   : > { %2507 = vmatprep.subr.bf16.mxu0 %v3009_v4 }
  0x3e   : > { %2106 = vmatmul.mubr.msk.f32.vlgmr.msra.gmra.mrb[0].mxu1 %vm299_vm5, %v3012_v14 }
  0x40   : > { %2509 = vmatpush3.bf16.msra.mxu0 %v2508_v36 }
  0xa5   : > { %v466_v39 = vpop.permute.xlu0 %465 }
  0xa6   : > { %2618 = vrcp.f32 %v466_v39 }
  0xb0   : > { %v2619_v45 = vpop.eup %2618 }
 0x10e   : > { %v2254_v37 = vpop.f32.mrb[0].mxu0 }
 0x10f   : > { %v2255_v38 = vpop.f32.mrb[1].mxu0 }
 0x110   : > { %v2256_v40 = vadd.f32 %v2255_v38, %v2254_v37 }
 0x111   : > { %v450_v42 = vpop.f32.mrb[0].mxu1 }
 0x112   : > { %v451_v4 = vadd.f32 %v2256_v40, %v450_v42  ;;  %v452_v43 = vpop.f32.mrb[1].mxu1 }
 0x114   : > { %v454_v44 = vadd.f32 %v451_v4, %v309_v41 }
 0x116   : > { %456 = vst.msk [vmem:[#allocation2] sm:$0xff] %vm455_vm7, %v454_v44 }
 0x11d   : > { %v461_v46 = vld [vmem:[#allocation2] sm:$0xff] }
 0x11e   : > { %585 = vst.msk [vmem:[#allocation2] sm:$0xff] %vm455_vm7, %v3011_v10  ;;  %v469_v47 = vmul.f32 %v2619_v45, %v461_v46 }
 0x120   : > { %2360 = vmatmul.mubr.msk.f32.vlgmr.msra.gmra.mrb[2].mxu0 %vm455_vm7, %v469_v47 }
 0x1f3   : > { %v543_v48 = vpop.f32.mrb[2].mxu0 }
 0x1f4   : > { %2620 = vtanh.f32 %v543_v48  ;;  %v2361_v49 = vpop.f32.mrb[3].mxu0 }
 0x1fe   : > { %v2621_v50 = vpop.eup %2620 }
 0x1ff   : > { %548 = vxpose.xlu0.b32.start.end [1/1] (short) (narrow) %v2621_v50, 32 }
 0x27f   : > { %v564_v51 = vpop.trf.xlu0 }
 0x280   : > { %581 = vst.msk [vmem:[#allocation3] sm:$0xff] %vm580_vm8, %v564_v51 }
 0x283   : > { %v565_v52 = vpop.trf.xlu0 }
 0x284   : > { %582 = vst.msk [vmem:[#allocation3 + $0x8] sm:$0xff] %vm580_vm8, %v565_v52 }
 0x287   : > { %v566_v53 = vpop.trf.xlu0 }
 0x288   : > { %583 = vst.msk [vmem:[#allocation3 + $0x10] sm:$0xff] %vm580_vm8, %v566_v53 }
 0x28b   : > { %v567_v54 = vpop.trf.xlu0 }
 0x28c   : > { %584 = vst.msk [vmem:[#allocation3 + $0x18] sm:$0xff] %vm580_vm8, %v567_v54 }
 0x28d PF: > { %p2108_p6 = scmp.ne.s32.totalorder %s2998_s15, 1 }
 0x28e   : > { %v671_v55 = vld [vmem:[#allocation3] sm:$0xff] (!%p2108_p6)  ;;  %v672_v56 = vld [vmem:[#allocation3 + $0x8] sm:$0xff] (!%p2108_p6)  ;;  %vm675_vm9 = vcmask (!%p2108_p6), 261120   ;;  %v590_v60 = vld [vmem:[%s3950_s2] sm:$0xff] (!%p2108_p6)  ;;  %v640_v61 = vlaneseq (!%p2108_p6)  ;;  %v3014_v13 = vmov (!%p2108_p6), 0.0   ;;  %vm1319_vm14 = vcmask (!%p2108_p6), 64512  }
 0x28f   : > { %589 = sbr.rel (%p2108_p6) target bundleno = 1423 (0x58f), region = 52  ;;  %v673_v57 = vld [vmem:[#allocation3 + $0x10] sm:$0xff] (!%p2108_p6)  ;;  %v2510_v58 = vpack.c.bf16 (!%p2108_p6), %v672_v56, %v671_v55  ;;  %2370 = vmatprep.mubr.msk.f32.mxu0 (!%p2108_p6), %vm675_vm9, %v590_v60  ;;  %v591_v0 = vld [vmem:[%s3950_s2 + $0x8] sm:$0xff] (!%p2108_p6)  ;;  %v592_v1 = vld [vmem:[%s3950_s2 + $0x10] sm:$0xff] (!%p2108_p6)  ;;  %vm1871_vm15 = vcmask (!%p2108_p6), 130048  }
 0x290   : > { %v3266_v63 = vshrl.u32 (!%p2108_p6), %v640_v61, 7  ;;  %v593_v6 = vld [vmem:[%s3950_s2 + $0x18] sm:$0xff] (!%p2108_p6)  ;;  %v3285_v7 = vld [vmem:[%s3948_s0] sm:$0xf] (!%p2108_p6)  ;;  %v595_v12 = vld [vmem:[%s3950_s2 + $0x28] sm:$0xff] (!%p2108_p6) }
 0x291   : > { %2511 = vmatprep.subr.bf16.mxu0 (!%p2108_p6), %v2510_v58  ;;  %v594_v8 = vld [vmem:[%s3950_s2 + $0x20] sm:$0xff] (!%p2108_p6)  ;;  %v596_v16 = vld [vmem:[%s3950_s2 + $0x30] sm:$0xff] (!%p2108_p6)  ;;  %v597_v19 = vld [vmem:[%s3950_s2 + $0x38] sm:$0xff] (!%p2108_p6) }
 0x292   : > { %2513 = vmatpush3.bf16.msra.mxu0 (!%p2108_p6), %v2510_v58  ;;  %v645_v2 = vsub.s32 (!%p2108_p6), 0, %v3266_v63  ;;  %v649_v3 = vsub.s32 (!%p2108_p6), 1, %v3266_v63  ;;  %v657_v5 = vsub.s32 (!%p2108_p6), 3, %v3266_v63  ;;  %v598_v20 = vld [vmem:[%s3950_s2 + $0x40] sm:$0xff] (!%p2108_p6)  ;;  %v599_v21 = vld [vmem:[%s3950_s2 + $0x48] sm:$0xff] (!%p2108_p6)  ;;  %v600_v22 = vld [vmem:[%s3950_s2 + $0x50] sm:$0xff] (!%p2108_p6) }
 0x293   : > { %v674_v59 = vld [vmem:[#allocation3 + $0x18] sm:$0xff] (!%p2108_p6)  ;;  %v601_v23 = vld [vmem:[%s3950_s2 + $0x58] sm:$0xff] (!%p2108_p6)  ;;  %v603_v25 = vld [vmem:[%s3950_s2 + $0x68] sm:$0xff] (!%p2108_p6)  ;;  %v653_v4 = vsub.s32 (!%p2108_p6), 2, %v3266_v63 }
 0x294   : > { %v2514_v62 = vpack.c.bf16 (!%p2108_p6), %v674_v59, %v673_v57  ;;  %v3291_v9 = vrot.slane (!%p2108_p6), %v3285_v7, %v645_v2  ;;  %v3294_v10 = vrot.slane (!%p2108_p6), %v3285_v7, %v649_v3  ;;  %v658_v11 = vrot.slane (!%p2108_p6), %v3285_v7, %v657_v5  ;;  %v602_v24 = vld [vmem:[%s3950_s2 + $0x60] sm:$0xff] (!%p2108_p6)  ;;  %v604_v26 = vld [vmem:[%s3950_s2 + $0x70] sm:$0xff] (!%p2108_p6)  ;;  %v605_v27 = vld [vmem:[%s3950_s2 + $0x78] sm:$0xff] (!%p2108_p6) }
 0x295   : > { %v606_v28 = vld [vmem:[%s3950_s2 + $0x80] sm:$0xff] (!%p2108_p6)  ;;  %v607_v29 = vld [vmem:[%s3950_s2 + $0x88] sm:$0xff] (!%p2108_p6)  ;;  %v608_v30 = vld [vmem:[%s3950_s2 + $0x90] sm:$0xff] (!%p2108_p6)  ;;  %v3428_v45 = vrot.slane (!%p2108_p6), %v3285_v7, %v653_v4 }
 0x296   : > { %2515 = vmatprep.subr.bf16.mxu0 %v2514_v62  ;;  %vm659_vm10 = vcmp.eq.s32.totalorder %v3266_v63, %v3291_v9  ;;  %vm660_vm11 = vcmp.eq.s32.totalorder %v3266_v63, %v3294_v10  ;;  %vm662_vm12 = vcmp.eq.s32.totalorder %v3266_v63, %v658_v11  ;;  %v609_v31 = vld [vmem:[%s3950_s2 + $0x98] sm:$0xff]  ;;  %v610_v32 = vld [vmem:[%s3950_s2 + $0xa0] sm:$0xff]  ;;  %v611_v33 = vld [vmem:[%s3950_s2 + $0xa8] sm:$0xff] }
 0x297   : > { %2517 = vmatpush3.bf16.msra.mxu0 %v2514_v62  ;;  %v2109_v14 = vsel %vm659_vm10, 1.0, %v3014_v13  ;;  %v2110_v15 = vsel %vm660_vm11, 1.0, %v3014_v13  ;;  %v3319_v18 = vsel %vm662_vm12, 1.0, %v3014_v13  ;;  %v612_v34 = vld [vmem:[%s3950_s2 + $0xb0] sm:$0xff]  ;;  %v613_v35 = vld [vmem:[%s3950_s2 + $0xb8] sm:$0xff]  ;;  %v614_v36 = vld [vmem:[%s3950_s2 + $0xc0] sm:$0xff]  ;;  %vm661_vm13 = vcmp.eq.s32.totalorder %v3266_v63, %v3428_v45 }
 0x298   : > { %v2622_v17 = vpack.i.bf16 %v2109_v14, %v2110_v15  ;;  %1237 = vxpose.xlu1.b32.start.end [1/1] (short) (narrow) %v3319_v18, 16  ;;  %v615_v37 = vld [vmem:[%s3950_s2 + $0xc8] sm:$0xff]  ;;  %v616_v38 = vld [vmem:[%s3950_s2 + $0xd0] sm:$0xff]  ;;  %v617_v39 = vld [vmem:[%s3950_s2 + $0xd8] sm:$0xff]  ;;  %v2111_v50 = vsel %vm661_vm13, 1.0, %v3014_v13 }
 0x299   : > { %v618_v40 = vld [vmem:[%s3950_s2 + $0xe0] sm:$0xff]  ;;  %v619_v41 = vld [vmem:[%s3950_s2 + $0xe8] sm:$0xff]  ;;  %v620_v42 = vld [vmem:[%s3950_s2 + $0xf0] sm:$0xff] }
 0x29a   : > { %2371 = vmatmul.mubr.msk.f32.vlgmr.msra.gmra.mrb[0].mxu0 %vm675_vm9, %v591_v0  ;;  %2623 = vxpose.xlu0.b32.start.end [1/1] (short) %v2622_v17, 128  ;;  %v621_v43 = vld [vmem:[%s3950_s2 + $0xf8] sm:$0xff]  ;;  %v622_v44 = vld [vmem:[%s3950_s2 + $0x100] sm:$0xff]  ;;  %v623_v46 = vld [vmem:[%s3950_s2 + $0x108] sm:$0xff] }
 0x29b   : > { %2373 = vmatprep.mubr.msk.f32.mxu0 %vm675_vm9, %v592_v1  ;;  %v624_v47 = vld [vmem:[%s3950_s2 + $0x110] sm:$0xff]  ;;  %v625_v48 = vld [vmem:[%s3950_s2 + $0x118] sm:$0xff]  ;;  %v626_v49 = vld [vmem:[%s3950_s2 + $0x120] sm:$0xff] }
 0x29c   : > { %v627_v51 = vld [vmem:[%s3950_s2 + $0x128] sm:$0xff]  ;;  %v628_v52 = vld [vmem:[%s3950_s2 + $0x130] sm:$0xff]  ;;  %v629_v53 = vld [vmem:[%s3950_s2 + $0x138] sm:$0xff] }
 0x29d   : > { %v630_v54 = vld [vmem:[%s3950_s2 + $0x140] sm:$0xff]  ;;  %v631_v55 = vld [vmem:[%s3950_s2 + $0x148] sm:$0xff]  ;;  %v632_v56 = vld [vmem:[%s3950_s2 + $0x150] sm:$0xff] }
 0x29e   : > { %2374 = vmatmul.mubr.msk.f32.gmra.mrb[2].mxu0 %vm675_vm9, %v593_v6  ;;  %v633_v57 = vld [vmem:[%s3950_s2 + $0x158] sm:$0xff]  ;;  %v634_v58 = vld [vmem:[%s3950_s2 + $0x160] sm:$0xff]  ;;  %v635_v59 = vld [vmem:[%s3950_s2 + $0x168] sm:$0xff] }
 0x29f   : > { %2376 = vmatprep.mubr.msk.f32.mxu0 %vm675_vm9, %v594_v8  ;;  %v636_v60 = vld [vmem:[%s3950_s2 + $0x170] sm:$0xff]  ;;  %v637_v61 = vld [vmem:[%s3950_s2 + $0x178] sm:$0xff]  ;;  %v638_v62 = vld [vmem:[%s3950_s2 + $0x180] sm:$0xff] }
 0x2a0   : > { %v639_v0 = vld [vmem:[%s3950_s2 + $0x188] sm:$0xff]  ;;  %v2940_v9 = vld [vmem:[%s3950_s2 + $0x120] sm:$0xff] }
 0x2a2   : > { %2377 = vmatmul.mubr.msk.f32.gmra.mrb[4].mxu0 %vm675_vm9, %v595_v12 }
 0x2a3   : > { %2379 = vmatprep.mubr.msk.f32.mxu0 %vm675_vm9, %v596_v16 }
 0x2a6   : > { %2380 = vmatmul.mubr.msk.f32.gmra.mrb[6].mxu0 %vm675_vm9, %v597_v19 }
 0x2a7   : > { %2382 = vmatprep.mubr.msk.f32.mxu0 %vm675_vm9, %v598_v20 }
 0x2aa   : > { %2383 = vmatmul.mubr.msk.f32.gmra.mrb[8].mxu0 %vm675_vm9, %v599_v21 }
 0x2ab   : > { %2385 = vmatprep.mubr.msk.f32.mxu0 %vm675_vm9, %v600_v22 }
 0x2ae   : > { %2386 = vmatmul.mubr.msk.f32.gmra.mrb[10].mxu0 %vm675_vm9, %v601_v23 }
 0x2af   : > { %2388 = vmatprep.mubr.msk.f32.mxu0 %vm675_vm9, %v602_v24 }
 0x2b2   : > { %2389 = vmatmul.mubr.msk.f32.gmra.mrb[12].mxu0 %vm675_vm9, %v603_v25 }
 0x2b3   : > { %2391 = vmatprep.mubr.msk.f32.mxu0 %vm675_vm9, %v604_v26 }
 0x2b6   : > { %2392 = vmatmul.mubr.msk.f32.gmra.mrb[14].mxu0 %vm675_vm9, %v605_v27 }
 0x2b7   : > { %2394 = vmatprep.mubr.msk.f32.mxu0 %vm675_vm9, %v606_v28 }
 0x2ba   : > { %2395 = vmatmul.mubr.msk.f32.gmra.mrb[16].mxu0 %vm675_vm9, %v607_v29 }
 0x2bb   : > { %2397 = vmatprep.mubr.msk.f32.mxu0 %vm675_vm9, %v608_v30 }
 0x2be   : > { %2398 = vmatmul.mubr.msk.f32.gmra.mrb[18].mxu0 %vm675_vm9, %v609_v31 }
 0x2bf   : > { %2400 = vmatprep.mubr.msk.f32.mxu0 %vm675_vm9, %v610_v32 }
 0x2c2   : > { %2401 = vmatmul.mubr.msk.f32.gmra.mrb[20].mxu0 %vm675_vm9, %v611_v33 }
 0x2c3   : > { %2403 = vmatprep.mubr.msk.f32.mxu0 %vm675_vm9, %v612_v34 }
 0x2c6   : > { %2404 = vmatmul.mubr.msk.f32.gmra.mrb[22].mxu0 %vm675_vm9, %v613_v35 }
 0x2c7   : > { %2406 = vmatprep.mubr.msk.f32.mxu0 %vm675_vm9, %v614_v36 }
 0x2ca   : > { %2407 = vmatmul.mubr.msk.f32.gmra.mrb[24].mxu0 %vm675_vm9, %v615_v37 }
 0x2cb   : > { %2409 = vmatprep.mubr.msk.f32.mxu0 %vm675_vm9, %v616_v38 }
 0x2ce   : > { %2410 = vmatmul.mubr.msk.f32.gmra.mrb[26].mxu0 %vm675_vm9, %v617_v39 }
 0x2cf   : > { %2412 = vmatprep.mubr.msk.f32.mxu0 %vm675_vm9, %v618_v40 }
 0x2d2   : > { %2413 = vmatmul.mubr.msk.f32.gmra.mrb[28].mxu0 %vm675_vm9, %v619_v41 }
 0x2d3   : > { %2415 = vmatprep.mubr.msk.f32.mxu0 %vm675_vm9, %v620_v42 }
 0x2d6   : > { %2416 = vmatmul.mubr.msk.f32.gmra.mrb[30].mxu0 %vm675_vm9, %v621_v43 }
 0x2d7   : > { %2418 = vmatprep.mubr.msk.f32.mxu0 %vm675_vm9, %v622_v44  ;;  %1205 = vxpose.xlu0.b32.start.end [1/1] (short) %v2111_v50, 128 }
 0x2da   : > { %2419 = vmatmul.mubr.msk.f32.gmra.mrb[32].mxu0 %vm675_vm9, %v623_v46 }
 0x2db   : > { %2421 = vmatprep.mubr.msk.f32.mxu0 %vm675_vm9, %v624_v47 }
 0x2de   : > { %2422 = vmatmul.mubr.msk.f32.gmra.mrb[34].mxu0 %vm675_vm9, %v625_v48 }
 0x2df   : > { %2424 = vmatprep.mubr.msk.f32.mxu0 %vm675_vm9, %v626_v49 }
 0x2e2   : > { %2425 = vmatmul.mubr.msk.f32.gmra.mrb[36].mxu0 %vm675_vm9, %v627_v51 }
 0x2e3   : > { %2427 = vmatprep.mubr.msk.f32.mxu0 %vm675_vm9, %v628_v52 }
 0x2e6   : > { %2428 = vmatmul.mubr.msk.f32.gmra.mrb[38].mxu0 %vm675_vm9, %v629_v53 }
 0x2e7   : > { %2430 = vmatprep.mubr.msk.f32.mxu0 %vm675_vm9, %v630_v54 }
 0x2ea   : > { %2431 = vmatmul.mubr.msk.f32.gmra.mrb[40].mxu0 %vm675_vm9, %v631_v55 }
 0x2eb   : > { %2433 = vmatprep.mubr.msk.f32.mxu0 %vm675_vm9, %v632_v56 }
 0x2ee   : > { %2434 = vmatmul.mubr.msk.f32.gmra.mrb[42].mxu0 %vm675_vm9, %v633_v57 }
 0x2ef   : > { %2436 = vmatprep.mubr.msk.f32.mxu0 %vm675_vm9, %v634_v58 }
 0x2f2   : > { %2437 = vmatmul.mubr.msk.f32.gmra.mrb[44].mxu0 %vm675_vm9, %v635_v59 }
 0x2f3   : > { %2439 = vmatprep.mubr.msk.f32.mxu0 %vm675_vm9, %v636_v60 }
 0x2f6   : > { %2440 = vmatmul.mubr.msk.f32.gmra.mrb[46].mxu0 %vm675_vm9, %v637_v61 }
 0x2f7   : > { %2442 = vmatprep.mubr.msk.f32.mxu0 %vm675_vm9, %v638_v62 }
 0x2fa   : > { %2443 = vmatmul.mubr.msk.f32.gmra.mrb[48].mxu0 %vm675_vm9, %v639_v0 }
 0x31a   : > { %v3506_v1 = vpop.trf.xlu0 }
 0x31b   : > { %v2628_v23 = vunpack.i.h.bf16 %v3506_v1 }
 0x31e   : > { %v3508_v2 = vpop.trf.xlu0 }
 0x31f   : > { %v2633_v21 = vunpack.i.h.bf16 %v3508_v2 }
 0x322   : > { %v3510_v3 = vpop.trf.xlu0 }
 0x323   : > { %v2638_v28 = vunpack.i.h.bf16 %v3510_v3 }
 0x326   : > { %v3512_v5 = vpop.trf.xlu0 }
 0x327   : > { %v2643_v26 = vunpack.i.h.bf16 %v3512_v5 }
 0x32a   : > { %v3514_v6 = vpop.trf.xlu0 }
 0x32b   : > { %v2648_v35 = vunpack.i.h.bf16 %v3514_v6 }
 0x32e   : > { %v3516_v7 = vpop.trf.xlu0 }
 0x32f   : > { %v2653_v33 = vunpack.i.h.bf16 %v3516_v7 }
 0x332   : > { %v3518_v8 = vpop.trf.xlu0 }
 0x333   : > { %v2658_v4 = vunpack.i.h.bf16 %v3518_v8 }
 0x336   : > { %v3520_v11 = vpop.trf.xlu0 }
 0x337   : > { %v2663_v41 = vunpack.i.h.bf16 %v3520_v11 }
 0x33a   : > { %v3522_v12 = vpop.trf.xlu0 }
 0x33b   : > { %v2668_v50 = vunpack.i.h.bf16 %v3522_v12 }
 0x33e   : > { %v3524_v13 = vpop.trf.xlu0 }
 0x33f   : > { %v2673_v48 = vunpack.i.h.bf16 %v3524_v13 }
 0x342   : > { %v3526_v14 = vpop.trf.xlu0 }
 0x343   : > { %v2678_v59 = vunpack.i.h.bf16 %v3526_v14 }
 0x346   : > { %v3528_v15 = vpop.trf.xlu0 }
 0x347   : > { %v2683_v57 = vunpack.i.h.bf16 %v3528_v15 }
 0x34a   : > { %v3530_v16 = vpop.trf.xlu0 }
 0x34e   : > { %v3532_v17 = vpop.trf.xlu0 }
 0x352   : > { %v3534_v19 = vpop.trf.xlu0 }
 0x356   : > { %v3536_v20 = vpop.trf.xlu0 }
 0x35a   : > { %v3549_v43 = vpop.trf.xlu0 }
 0x35e   : > { %v3554_v53 = vpop.trf.xlu0 }
 0x362   : > { %v3559_v61 = vpop.trf.xlu0 }
 0x36d   : > { %v2372_v22 = vpop.f32.mrb[0].mxu0 }
 0x36e   : > { %v1270_v24 = vmul.f32 %v2633_v21, %v2372_v22  ;;  %v892_v25 = vpop.f32.mrb[1].mxu0  ;;  %v2693_v21 = vunpack.i.h.bf16 %v3532_v17 }
 0x36f   : > { %v1269_v27 = vmul.f32 %v2628_v23, %v892_v25  ;;  %v2688_v23 = vunpack.i.h.bf16 %v3530_v16 }
 0x370   : > { %v1323_v29 = vsel %vm1319_vm14, %v1270_v24, 0.0 }
 0x371   : > { %1324 = vadd.xlane.f32.xlu1 %v1323_v29  ;;  %v2375_v30 = vpop.f32.mrb[2].mxu0  ;;  %v1320_v36 = vsel %vm1319_vm14, %v1269_v27, 0.0  ;;  %v2703_v29 = vunpack.i.h.bf16 %v3536_v20 }
 0x372   : > { %v1272_v31 = vmul.f32 %v2643_v26, %v2375_v30  ;;  %v902_v32 = vpop.f32.mrb[3].mxu0  ;;  %v2698_v30 = vunpack.i.h.bf16 %v3534_v19 }
 0x373   : > { %v1271_v34 = vmul.f32 %v2638_v28, %v902_v32 }
 0x374   : > { %v1329_v39 = vsel %vm1319_vm14, %v1272_v31, 0.0  ;;  %v3569_v31 = vpop.trf.xlu0 }
 0x375   : > { %1321 = vadd.xlane.f32.xlu1 %v1320_v36  ;;  %v2378_v37 = vpop.f32.mrb[4].mxu0  ;;  %v1326_v51 = vsel %vm1319_vm14, %v1271_v34, 0.0 }
 0x376   : > { %v1274_v38 = vmul.f32 %v2653_v33, %v2378_v37  ;;  %v912_v40 = vpop.f32.mrb[5].mxu0 }
 0x377   : > { %v1273_v42 = vmul.f32 %v2648_v35, %v912_v40  ;;  %v2625_v40 = vunpack.i.l.bf16 %v3506_v1 }
 0x378   : > { %v1335_v54 = vsel %vm1319_vm14, %v1274_v38, 0.0  ;;  %v2630_v38 = vunpack.i.l.bf16 %v3508_v2 }
 0x379   : > { %1330 = vadd.xlane.f32.xlu1 %v1329_v39  ;;  %v2381_v44 = vpop.f32.mrb[6].mxu0  ;;  %v1332_v24 = vsel %vm1319_vm14, %v1273_v42, 0.0 }
 0x37a   : > { %v1276_v46 = vmul.f32 %v2663_v41, %v2381_v44  ;;  %v922_v47 = vpop.f32.mrb[7].mxu0  ;;  %v3580_v41 = vpop.trf.xlu0 }
 0x37b   : > { %v1275_v49 = vmul.f32 %v2658_v4, %v922_v47  ;;  %v2640_v47 = vunpack.i.l.bf16 %v3512_v5 }
 0x37c   : > { %v1341_v26 = vsel %vm1319_vm14, %v1276_v46, 0.0 }
 0x37d   : > { %1327 = vadd.xlane.f32.xlu1 %v1326_v51  ;;  %v2384_v52 = vpop.f32.mrb[8].mxu0  ;;  %v1338_v37 = vsel %vm1319_vm14, %v1275_v49, 0.0 }
 0x37e   : > { %v1278_v55 = vmul.f32 %v2673_v48, %v2384_v52  ;;  %v932_v56 = vpop.f32.mrb[9].mxu0  ;;  %v3585_v52 = vpop.trf.xlu0 }
 0x37f   : > { %v1277_v58 = vmul.f32 %v2668_v50, %v932_v56  ;;  %v2635_v50 = vunpack.i.l.bf16 %v3510_v3  ;;  %v2660_v3 = vunpack.i.l.bf16 %v3520_v11 }
 0x380   : > { %v1347_v44 = vsel %vm1319_vm14, %v1278_v55, 0.0  ;;  %v2645_v55 = vunpack.i.l.bf16 %v3514_v6 }
 0x381   : > { %1336 = vadd.xlane.f32.xlu1 %v1335_v54  ;;  %v2387_v60 = vpop.f32.mrb[10].mxu0  ;;  %v1344_v1 = vsel %vm1319_vm14, %v1277_v58, 0.0  ;;  %v2650_v54 = vunpack.i.l.bf16 %v3516_v7 }
 0x382   : > { %v1280_v62 = vmul.f32 %v2683_v57, %v2387_v60  ;;  %v942_v0 = vpop.f32.mrb[11].mxu0 }
 0x383   : > { %v1279_v22 = vmul.f32 %v2678_v59, %v942_v0 }
 0x384   : > { %v1353_v60 = vsel %vm1319_vm14, %v1280_v62, 0.0  ;;  %v2665_v62 = vunpack.i.l.bf16 %v3522_v12 }
 0x385   : > { %1333 = vadd.xlane.f32.xlu1 %v1332_v24  ;;  %v2390_v25 = vpop.f32.mrb[12].mxu0  ;;  %v1350_v6 = vsel %vm1319_vm14, %v1279_v22, 0.0 }
 0x386   : > { %v952_v27 = vpop.f32.mrb[13].mxu0  ;;  %v3565_v28 = vmul.f32 %v2693_v21, %v2390_v25  ;;  %v2655_v21 = vunpack.i.l.bf16 %v3518_v8  ;;  %v2670_v25 = vunpack.i.l.bf16 %v3524_v13  ;;  %v2675_v13 = vunpack.i.l.bf16 %v3526_v14 }
 0x387   : > { %v3571_v32 = vmul.f32 %v2688_v23, %v952_v27  ;;  %v3595_v23 = vpop.trf.xlu0 }
 0x389   : > { %1342 = vadd.xlane.f32.xlu1 %v1341_v26  ;;  %v2393_v33 = vpop.f32.mrb[14].mxu0 }
 0x38a   : > { %v962_v34 = vpop.f32.mrb[15].mxu0  ;;  %v3573_v35 = vmul.f32 %v2703_v29, %v2393_v33 }
 0x38b   : > { %v3575_v36 = vmul.f32 %v2698_v30, %v962_v34  ;;  %v3606_v8 = vpop.trf.xlu0  ;;  %v2680_v34 = vunpack.i.l.bf16 %v3528_v15 }
 0x38d   : > { %1339 = vadd.xlane.f32.xlu1 %v1338_v37  ;;  %v2396_v39 = vpop.f32.mrb[16].mxu0 }
 0x38e   : > { %v1286_v42 = vmul.f32 %v2630_v38, %v2396_v39  ;;  %v972_v4 = vpop.f32.mrb[17].mxu0  ;;  %v2690_v38 = vunpack.i.l.bf16 %v3532_v17 }
 0x38f   : > { %v1285_v46 = vmul.f32 %v2625_v40, %v972_v4  ;;  %v2685_v40 = vunpack.i.l.bf16 %v3530_v16  ;;  %v1359_v4 = vsel %vm1319_vm14, %v3565_v28, 0.0 }
 0x390   : > { %v1371_v30 = vsel %vm1319_vm14, %v1286_v42, 0.0 }
 0x391   : > { %1348 = vadd.xlane.f32.xlu1 %v1347_v44  ;;  %v2399_v48 = vpop.f32.mrb[18].mxu0  ;;  %v1368_v42 = vsel %vm1319_vm14, %v1285_v46, 0.0  ;;  %v3621_v44 = vpop.trf.xlu0  ;;  %v1362_v46 = vsel %vm1319_vm14, %v3575_v36, 0.0 }
 0x392   : > { %v1288_v49 = vmul.f32 %v2640_v47, %v2399_v48  ;;  %v982_v51 = vpop.f32.mrb[19].mxu0  ;;  %v2700_v48 = vunpack.i.l.bf16 %v3536_v20  ;;  %v1365_v20 = vsel %vm1319_vm14, %v3573_v35, 0.0 }
 0x393   : > { %v1287_v2 = vmul.f32 %v2635_v50, %v982_v51  ;;  %v2695_v50 = vunpack.i.l.bf16 %v3534_v19 }
 0x394   : > { %v1377_v16 = vsel %vm1319_vm14, %v1288_v49, 0.0 }
 0x395   : > { %1345 = vadd.xlane.f32.xlu1 %v1344_v1  ;;  %v2402_v56 = vpop.f32.mrb[20].mxu0 }
 0x396   : > { %v1290_v57 = vmul.f32 %v2650_v54, %v2402_v56  ;;  %v992_v59 = vpop.f32.mrb[21].mxu0  ;;  %v1230_v56 = vpop.trf.xlu0 }
 0x397   : > { %v3590_v5 = vmul.f32 %v2645_v55, %v992_v59  ;;  %v1374_v55 = vsel %vm1319_vm14, %v1287_v2, 0.0 }
 0x398   : > { %v1383_v36 = vsel %vm1319_vm14, %v1290_v57, 0.0 }
 0x399   : > { %1354 = vadd.xlane.f32.xlu1 %v1353_v60  ;;  %v2405_v0 = vpop.f32.mrb[22].mxu0  ;;  %v1380_v35 = vsel %vm1319_vm14, %v3590_v5, 0.0 }
 0x39a   : > { %v3597_v58 = vmul.f32 %v2660_v3, %v2405_v0  ;;  %v1002_v7 = vpop.f32.mrb[23].mxu0  ;;  %v3637_v3 = vpop.trf.xlu0 }
 0x39b   : > { %v3599_v24 = vmul.f32 %v2655_v21, %v1002_v7 }
 0x39d   : > { %1351 = vadd.xlane.f32.xlu1 %v1350_v6  ;;  %v2408_v26 = vpop.f32.mrb[24].mxu0 }
 0x39e   : > { %v1294_v11 = vmul.f32 %v2670_v25, %v2408_v26  ;;  %v1012_v27 = vpop.f32.mrb[25].mxu0  ;;  %v1232_v26 = vpop.trf.xlu0 }
 0x39f   : > { %v3604_v29 = vmul.f32 %v2665_v62, %v1012_v27  ;;  %v1389_v62 = vsel %vm1319_vm14, %v3597_v58, 0.0 }
 0x3a0   : > { %v1395_v33 = vsel %vm1319_vm14, %v1294_v11, 0.0 }
 0x3a1   : > { %1372 = vadd.xlane.f32.xlu1 %v1371_v30  ;;  %1396 = vadd.xlane.f32.xlu0 %v1395_v33  ;;  %v2411_v22 = vpop.f32.mrb[26].mxu0  ;;  %v1386_v30 = vsel %vm1319_vm14, %v3599_v24, 0.0 }
 0x3a2   : > { %v3612_v37 = vmul.f32 %v2680_v34, %v2411_v22  ;;  %v1022_v12 = vpop.f32.mrb[27].mxu0 }
 0x3a3   : > { %v3615_v39 = vmul.f32 %v2675_v13, %v1022_v12  ;;  %v1392_v13 = vsel %vm1319_vm14, %v3604_v29, 0.0 }
 0x3a5   : > { %1369 = vadd.xlane.f32.xlu1 %v1368_v42  ;;  %1360 = vadd.xlane.f32.xlu0 %v1359_v4  ;;  %v2414_v15 = vpop.f32.mrb[28].mxu0  ;;  %v1401_v42 = vsel %vm1319_vm14, %v3612_v37, 0.0  ;;  %v1398_v29 = vsel %vm1319_vm14, %v3615_v39, 0.0 }
 0x3a6   : > { %v3623_v14 = vmul.f32 %v2690_v38, %v2414_v15  ;;  %v1032_v47 = vpop.f32.mrb[29].mxu0 }
 0x3a7   : > { %v3626_v17 = vmul.f32 %v2685_v40, %v1032_v47 }
 0x3a8   : > { %v1407_v37 = vsel %vm1319_vm14, %v3623_v14, 0.0 }
 0x3a9   : > { %1378 = vadd.xlane.f32.xlu1 %v1377_v16  ;;  %1363 = vadd.xlane.f32.xlu0 %v1362_v46  ;;  %v2417_v28 = vpop.f32.mrb[30].mxu0 }
 0x3aa   : > { %v1300_v51 = vmul.f32 %v2700_v48, %v2417_v28  ;;  %v1042_v1 = vpop.f32.mrb[31].mxu0  ;;  %v1253_v28 = vpop.trf.xlu1 }
 0x3ab   : > { %v1299_v54 = vmul.f32 %v2695_v50, %v1042_v1 }
 0x3ac   : > { %v1413_v49 = vsel %vm1319_vm14, %v1300_v51, 0.0 }
 0x3ad   : > { %1375 = vadd.xlane.f32.xlu1 %v1374_v55  ;;  %1366 = vadd.xlane.f32.xlu0 %v1365_v20  ;;  %v2420_v19 = vpop.f32.mrb[32].mxu0  ;;  %v1410_v0 = vsel %vm1319_vm14, %v1299_v54, 0.0  ;;  %v1404_v55 = vsel %vm1319_vm14, %v3626_v17, 0.0 }
 0x3ae   : > { %v1052_v59 = vpop.f32.mrb[33].mxu0  ;;  %v1302_v2 = vmul.f32 %v2420_v19, %v3554_v53 }
 0x3af   : > { %v1301_v57 = vmul.f32 %v3549_v43, %v1052_v59  ;;  %v3651_v43 = vpop.trf.xlu0  ;;  %v1356_v59 = vsel %vm1319_vm14, %v3571_v32, 0.0 }
 0x3b0   : > { %v1419_v6 = vsel %vm1319_vm14, %v1302_v2, 0.0 }
 0x3b1   : > { %1384 = vadd.xlane.f32.xlu1 %v1383_v36  ;;  %1414 = vadd.xlane.f32.xlu0 %v1413_v49  ;;  %v2423_v60 = vpop.f32.mrb[34].mxu0  ;;  %v1416_v53 = vsel %vm1319_vm14, %v1301_v57, 0.0  ;;  %v1254_v49 = vpop.trf.xlu1 }
 0x3b2   : > { %v1062_v21 = vpop.f32.mrb[35].mxu0  ;;  %v1304_v27 = vmul.f32 %v2423_v60, %v3569_v31 }
 0x3b3   : > { %v1234_v40 = vpop.trf.xlu0  ;;  %v1303_v14 = vmul.f32 %v3559_v61, %v1062_v21 }
 0x3b4   : > { %v1425_v58 = vsel %vm1319_vm14, %v1304_v27, 0.0 }
 0x3b5   : > { %1381 = vadd.xlane.f32.xlu1 %v1380_v35  ;;  %1411 = vadd.xlane.f32.xlu0 %v1410_v0  ;;  %v2426_v7 = vpop.f32.mrb[36].mxu0  ;;  %v1422_v17 = vsel %vm1319_vm14, %v1303_v14, 0.0 }
 0x3b6   : > { %v1072_v25 = vpop.f32.mrb[37].mxu0  ;;  %v1306_v34 = vmul.f32 %v2426_v7, %v3585_v52 }
 0x3b7   : > { %v1305_v0 = vmul.f32 %v3580_v41, %v1072_v25 }
 0x3b8   : > { %v1431_v24 = vsel %vm1319_vm14, %v1306_v34, 0.0 }
 0x3b9   : > { %1390 = vadd.xlane.f32.xlu1 %v1389_v62  ;;  %1420 = vadd.xlane.f32.xlu0 %v1419_v6  ;;  %v2429_v11 = vpop.f32.mrb[38].mxu0  ;;  %v1428_v61 = vsel %vm1319_vm14, %v1305_v0, 0.0 }
 0x3ba   : > { %v1082_v5 = vpop.f32.mrb[39].mxu0  ;;  %v1308_v12 = vmul.f32 %v2429_v11, %v3606_v8  ;;  %v1235_v8 = vpop.trf.xlu0 }
 0x3bb   : > { %v1307_v35 = vmul.f32 %v3595_v23, %v1082_v5  ;;  %v3015_v5 = vmov 1.0  }
 0x3bc   : > { %v1437_v15 = vsel %vm1319_vm14, %v1308_v12, 0.0  ;;  %2213 = vmatprep.mubr.msk.f32.mxu1 %vm660_vm11, %v3015_v5 }
 0x3bd   : > { %1387 = vadd.xlane.f32.xlu1 %v1386_v30  ;;  %1417 = vadd.xlane.f32.xlu0 %v1416_v53  ;;  %v2432_v33 = vpop.f32.mrb[40].mxu0  ;;  %v1434_v21 = vsel %vm1319_vm14, %v1307_v35, 0.0 }
 0x3be   : > { %v1092_v22 = vpop.f32.mrb[41].mxu0  ;;  %v1310_v4 = vmul.f32 %v2432_v33, %v1230_v56  ;;  %v1236_v39 = vpop.trf.xlu0 }
 0x3bf   : > { %v1309_v32 = vmul.f32 %v3621_v44, %v1092_v22 }
 0x3c0   : > { %v1443_v16 = vsel %vm1319_vm14, %v1310_v4, 0.0 }
 0x3c1   : > { %1393 = vadd.xlane.f32.xlu1 %v1392_v13  ;;  %1426 = vadd.xlane.f32.xlu0 %v1425_v58  ;;  %v2435_v31 = vpop.f32.mrb[42].mxu0  ;;  %v1440_v41 = vsel %vm1319_vm14, %v1309_v32, 0.0 }
 0x3c2   : > { %v1102_v38 = vpop.f32.mrb[43].mxu0  ;;  %v1312_v50 = vmul.f32 %v2435_v31, %v1232_v26 }
 0x3c3   : > { %v1311_v7 = vmul.f32 %v3637_v3, %v1102_v38 }
 0x3c4   : > { %v1449_v54 = vsel %vm1319_vm14, %v1312_v50, 0.0 }
 0x3c5   : > { %1402 = vadd.xlane.f32.xlu1 %v1401_v42  ;;  %1432 = vadd.xlane.f32.xlu0 %v1431_v24  ;;  %v2438_v52 = vpop.f32.mrb[44].mxu0  ;;  %v1446_v57 = vsel %vm1319_vm14, %v1311_v7, 0.0 }
 0x3c6   : > { %v1112_v47 = vpop.f32.mrb[45].mxu0  ;;  %v1314_v1 = vmul.f32 %v2438_v52, %v1234_v40 }
 0x3c7   : > { %v1313_v6 = vmul.f32 %v3651_v43, %v1112_v47 }
 0x3c8   : > { %v1455_v20 = vsel %vm1319_vm14, %v1314_v1, 0.0 }
 0x3c9   : > { %1399 = vadd.xlane.f32.xlu1 %v1398_v29  ;;  %1438 = vadd.xlane.f32.xlu0 %v1437_v15  ;;  %v2441_v48 = vpop.f32.mrb[46].mxu0  ;;  %v1452_v23 = vsel %vm1319_vm14, %v1313_v6, 0.0 }
 0x3ca   : > { %v1122_v46 = vpop.f32.mrb[47].mxu0  ;;  %v1316_v19 = vmul.f32 %v2441_v48, %v1236_v39 }
 0x3cb   : > { %v1315_v25 = vmul.f32 %v1235_v8, %v1122_v46 }
 0x3cc   : > { %v1461_v60 = vsel %vm1319_vm14, %v1316_v19, 0.0 }
 0x3cd   : > { %1408 = vadd.xlane.f32.xlu1 %v1407_v37  ;;  %1444 = vadd.xlane.f32.xlu0 %v1443_v16  ;;  %v2444_v51 = vpop.f32.mrb[48].mxu0  ;;  %v1458_v26 = vsel %vm1319_vm14, %v1315_v25, 0.0 }
 0x3ce   : > { %v1132_v56 = vpop.f32.mrb[49].mxu0  ;;  %v1318_v36 = vmul.f32 %v2444_v51, %v1254_v49 }
 0x3cf   : > { %v1317_v44 = vmul.f32 %v1253_v28, %v1132_v56 }
 0x3d0   : > { %v1467_v2 = vsel %vm1319_vm14, %v1318_v36, 0.0 }
 0x3d1   : > { %1405 = vadd.xlane.f32.xlu1 %v1404_v55  ;;  %1450 = vadd.xlane.f32.xlu0 %v1449_v54  ;;  %v1464_v62 = vsel %vm1319_vm14, %v1317_v44, 0.0 }
 0x3d5   : > { %1357 = vadd.xlane.f32.xlu1 %v1356_v59  ;;  %1456 = vadd.xlane.f32.xlu0 %v1455_v20 }
 0x3d9   : > { %1423 = vadd.xlane.f32.xlu1 %v1422_v17  ;;  %1462 = vadd.xlane.f32.xlu0 %v1461_v60 }
 0x3dd   : > { %1429 = vadd.xlane.f32.xlu1 %v1428_v61  ;;  %1468 = vadd.xlane.f32.xlu0 %v1467_v2 }
 0x3e1   : > { %1435 = vadd.xlane.f32.xlu1 %v1434_v21 }
 0x3e5   : > { %1441 = vadd.xlane.f32.xlu1 %v1440_v41 }
 0x3e9   : > { %1447 = vadd.xlane.f32.xlu1 %v1446_v57 }
 0x3ed   : > { %1453 = vadd.xlane.f32.xlu1 %v1452_v23 }
 0x3f1   : > { %1459 = vadd.xlane.f32.xlu1 %v1458_v26 }
 0x3f5   : > { %1465 = vadd.xlane.f32.xlu1 %v1464_v62 }
 0x3fe   : > { %v1325_v3 = vpop.xlane.xlu1 %1324 }
 0x3ff   : > { %v2164_v58 = vmul.f32 -10.0, %v1325_v3 }
 0x401   : > { %v1572_v13 = vmul.f32 1.442695, %v2164_v58 }
 0x402   : > { %v1322_v11 = vpop.xlane.xlu1 %1321 }
 0x403   : > { %v2163_v31 = vmul.f32 -10.0, %v1322_v11  ;;  %2704 = vpow2.f32 %v1572_v13 }
 0x405   : > { %v1570_v40 = vmul.f32 1.442695, %v2163_v31 }
 0x406   : > { %v1331_v53 = vpop.xlane.xlu1 %1330 }
 0x407   : > { %v2166_v12 = vmul.f32 -10.0, %v1331_v53  ;;  %2706 = vpow2.f32 %v1570_v40 }
 0x409   : > { %v1576_v42 = vmul.f32 1.442695, %v2166_v12 }
 0x40a   : > { %v1328_v27 = vpop.xlane.xlu1 %1327 }
 0x40b   : > { %v2165_v24 = vmul.f32 -10.0, %v1328_v27  ;;  %2708 = vpow2.f32 %v1576_v42 }
 0x40d   : > { %v1574_v52 = vmul.f32 1.442695, %v2165_v24  ;;  %v2705_v29 = vpop.eup %2704 }
 0x40e   : > { %v1337_v30 = vpop.xlane.xlu1 %1336  ;;  %v1671_v37 = vadd.f32 1.0, %v2705_v29 }
 0x40f   : > { %v2168_v15 = vmul.f32 -10.0, %v1337_v30  ;;  %2710 = vpow2.f32 %v1574_v52 }
 0x411   : > { %v1580_v47 = vmul.f32 1.442695, %v2168_v15  ;;  %v2707_v28 = vpop.eup %2706 }
 0x412   : > { %v1334_v33 = vpop.xlane.xlu1 %1333  ;;  %v1670_v49 = vadd.f32 1.0, %v2707_v28 }
 0x413   : > { %v2167_v8 = vmul.f32 -10.0, %v1334_v33  ;;  %2712 = vpow2.f32 %v1580_v47 }
 0x415   : > { %v1578_v51 = vmul.f32 1.442695, %v2167_v8  ;;  %v2709_v54 = vpop.eup %2708 }
 0x416   : > { %v1343_v43 = vpop.xlane.xlu1 %1342  ;;  %v1673_v59 = vadd.f32 1.0, %v2709_v54 }
 0x417   : > { %v2170_v48 = vmul.f32 -10.0, %v1343_v43 }
 0x419   : > { %v1584_v56 = vmul.f32 1.442695, %v2170_v48  ;;  %v2711_v55 = vpop.eup %2710 }
 0x41a   : > { %v1340_v34 = vpop.xlane.xlu1 %1339  ;;  %v1672_v0 = vadd.f32 1.0, %v2711_v55 }
 0x41b   : > { %v2169_v14 = vmul.f32 -10.0, %v1340_v34 }
 0x41d   : > { %v1582_v61 = vmul.f32 1.442695, %v2169_v14  ;;  %v2713_v32 = vpop.eup %2712 }
 0x41e   : > { %v1349_v22 = vpop.xlane.xlu1 %1348  ;;  %v1675_v26 = vadd.f32 1.0, %v2713_v32 }
 0x41f   : > { %v2172_v36 = vmul.f32 -10.0, %v1349_v22 }
 0x421   : > { %v1588_v21 = vmul.f32 1.442695, %v2172_v36 }
 0x422   : > { %v1346_v38 = vpop.xlane.xlu1 %1345 }
 0x423   : > { %v2171_v17 = vmul.f32 -10.0, %v1346_v38 }
 0x425   : > { %v1586_v57 = vmul.f32 1.442695, %v2171_v17 }
 0x426   : > { %v1355_v4 = vpop.xlane.xlu1 %1354 }
 0x427   : > { %v2174_v7 = vmul.f32 -10.0, %v1355_v4 }
 0x429   : > { %v1592_v62 = vmul.f32 1.442695, %v2174_v7  ;;  %v2904_v7 = vld [vmem:[%s3950_s2] sm:$0xff] }
 0x42a   : > { %v1352_v10 = vpop.xlane.xlu1 %1351 }
 0x42b   : > { %v2173_v3 = vmul.f32 -10.0, %v1352_v10 }
 0x42d   : > { %v1590_v13 = vmul.f32 1.442695, %v2173_v3 }
 0x42e   : > { %v1373_v50 = vpop.xlane.xlu1 %1372  ;;  %v1397_v16 = vpop.xlane.xlu0 %1396 }
 0x42f   : > { %v2180_v46 = vmul.f32 -10.0, %v1373_v50  ;;  %v2188_v31 = vmul.f32 -10.0, %v1397_v16 }
 0x431   : > { %v1604_v1 = vmul.f32 1.442695, %v2180_v46  ;;  %v1620_v29 = vmul.f32 1.442695, %v2188_v31 }
 0x432   : > { %v1370_v39 = vpop.xlane.xlu1 %1369  ;;  %v3693_v19 = vpop.xlane.xlu0 %1360 }
 0x433   : > { %2714 = vpow2.f32 %v1604_v1  ;;  %v2179_v20 = vmul.f32 -10.0, %v1370_v39 }
 0x434   : > { %2716 = vrcp.f32 %v1671_v37 }
 0x435   : > { %2718 = vpow2.f32 %v1578_v51  ;;  %v1602_v60 = vmul.f32 1.442695, %v2179_v20 }
 0x436   : > { %2720 = vpow2.f32 %v1584_v56  ;;  %v1379_v2 = vpop.xlane.xlu1 %1378  ;;  %v3695_v6 = vpop.xlane.xlu0 %1363  ;;  %v2176_v56 = vmul.f32 -10.0, %v3693_v19 }
 0x437   : > { %2722 = vpow2.f32 %v1602_v60  ;;  %v2182_v35 = vmul.f32 -10.0, %v1379_v2 }
 0x438   : > { %2724 = vrcp.f32 %v1670_v49 }
 0x439   : > { %2726 = vrcp.f32 %v1673_v59  ;;  %v1608_v41 = vmul.f32 1.442695, %v2182_v35  ;;  %v1596_v35 = vmul.f32 1.442695, %v2176_v56  ;;  %v2909_v56 = vld [vmem:[%s3950_s2 + $0x90] sm:$0xff] }
 0x43a   : > { %2728 = vrcp.f32 %v1672_v0  ;;  %v1376_v23 = vpop.xlane.xlu1 %1375  ;;  %v3699_v43 = vpop.xlane.xlu0 %1366 }
 0x43b   : > { %2730 = vpow2.f32 %v1608_v41  ;;  %v2181_v25 = vmul.f32 -10.0, %v1376_v23 }
 0x43c   : > { %2732 = vpow2.f32 %v1582_v61 }
 0x43d   : > { %v2715_v44 = vpop.eup %2714  ;;  %2734 = vpow2.f32 %v1588_v21  ;;  %v1606_v11 = vmul.f32 1.442695, %v2181_v25  ;;  %v2905_v25 = vld [vmem:[%s3950_s2 + $0x80] sm:$0xff] }
 0x43e   : > { %v3697_v53 = vpop.eup %2716  ;;  %2736 = vpow2.f32 %v1586_v57  ;;  %v1687_v27 = vadd.f32 1.0, %v2715_v44  ;;  %v1385_v30 = vpop.xlane.xlu1 %1384  ;;  %v2906_v44 = vld [vmem:[%s3950_s2 + $0x88] sm:$0xff] }
 0x43f   : > { %v2719_v33 = vpop.eup %2718  ;;  %2738 = vpow2.f32 %v1606_v11  ;;  %v2184_v34 = vmul.f32 -10.0, %v1385_v30  ;;  %v1415_v8 = vpop.xlane.xlu0 %1414  ;;  %v2907_v30 = vld [vmem:[%s3950_s2 + $0x8] sm:$0xff] }
 0x440   : > { %v2721_v58 = vpop.eup %2720  ;;  %2740 = vrcp.f32 %v1675_v26  ;;  %v1674_v38 = vadd.f32 1.0, %v2719_v33  ;;  %v1821_v33 = vmul.f32 %v2907_v30, %v3697_v53 }
 0x441   : > { %v2723_v22 = vpop.eup %2722  ;;  %2742 = vpow2.f32 %v1592_v62  ;;  %v1612_v12 = vmul.f32 1.442695, %v2184_v34  ;;  %v1677_v10 = vadd.f32 1.0, %v2721_v58  ;;  %v2194_v58 = vmul.f32 -10.0, %v1415_v8 }
 0x442   : > { %v2725_v24 = vpop.eup %2724  ;;  %2744 = vrcp.f32 %v1687_v27  ;;  %v1686_v40 = vadd.f32 1.0, %v2723_v22  ;;  %v1382_v42 = vpop.xlane.xlu1 %1381  ;;  %v2178_v27 = vmul.f32 -10.0, %v3699_v43 }
 0x443   : > { %v3701_v52 = vpop.eup %2726  ;;  %2746 = vpow2.f32 %v1612_v12  ;;  %v2183_v4 = vmul.f32 -10.0, %v1382_v42  ;;  %v1412_v36 = vpop.xlane.xlu0 %1411  ;;  %v1820_v41 = vmul.f32 %v2904_v7, %v2725_v24 }
 0x444   : > { %v3703_v15 = vpop.eup %2728  ;;  %2748 = vrcp.f32 %v1686_v40 }
 0x445   : > { %v2731_v47 = vpop.eup %2730  ;;  %2750 = vpow2.f32 %v1590_v13  ;;  %v1610_v48 = vmul.f32 1.442695, %v2183_v4  ;;  %v2520_v42 = vpack.c.bf16 %v1821_v33, %v1820_v41  ;;  %v2912_v33 = vld [vmem:[%s3950_s2 + $0x20] sm:$0xff] }
 0x446   : > { %v2733_v50 = vpop.eup %2732  ;;  %2752 = vrcp.f32 %v1674_v38  ;;  %v1689_v16 = vadd.f32 1.0, %v2731_v47  ;;  %v1391_v46 = vpop.xlane.xlu1 %1390  ;;  %v1600_v47 = vmul.f32 1.442695, %v2178_v27 }
 0x447   : > { %v2735_v37 = vpop.eup %2734  ;;  %2754 = vpow2.f32 %v1610_v48  ;;  %v2186_v28 = vmul.f32 -10.0, %v1391_v46  ;;  %v1676_v54 = vadd.f32 1.0, %v2733_v50  ;;  %v1421_v22 = vpop.xlane.xlu0 %1420  ;;  %v2193_v50 = vmul.f32 -10.0, %v1412_v36 }
 0x448   : > { %v2737_v51 = vpop.eup %2736  ;;  %2756 = vrcp.f32 %v1677_v10  ;;  %v1679_v20 = vadd.f32 1.0, %v2735_v37  ;;  %v2908_v37 = vld [vmem:[%s3950_s2 + $0x10] sm:$0xff] }
 0x449   : > { %v2739_v1 = vpop.eup %2738  ;;  %2758 = vpow2.f32 %v1620_v29  ;;  %v1616_v39 = vmul.f32 1.442695, %v2186_v28  ;;  %v1678_v17 = vadd.f32 1.0, %v2737_v51  ;;  %v1632_v29 = vmul.f32 1.442695, %v2194_v58 }
 0x44a   : > { %v3706_v55 = vpop.eup %2740  ;;  %2760 = vrcp.f32 %v1689_v16  ;;  %v1688_v49 = vadd.f32 1.0, %v2739_v1  ;;  %v1388_v14 = vpop.xlane.xlu1 %1387  ;;  %v1822_v28 = vmul.f32 %v2908_v37, %v3703_v15  ;;  %v2911_v15 = vld [vmem:[%s3950_s2 + $0x18] sm:$0xff] }
 0x44b   : > { %v2743_v59 = vpop.eup %2742  ;;  %2762 = vpow2.f32 %v1616_v39  ;;  %v2185_v60 = vmul.f32 -10.0, %v1388_v14  ;;  %v1418_v1 = vpop.xlane.xlu0 %1417  ;;  %v1823_v36 = vmul.f32 %v2911_v15, %v3701_v52 }
 0x44c   : > { %v2745_v0 = vpop.eup %2744  ;;  %2764 = vrcp.f32 %v1688_v49  ;;  %v1681_v11 = vadd.f32 1.0, %v2743_v59  ;;  %v2177_v59 = vmul.f32 -10.0, %v3695_v6 }
 0x44d   : > { %v2747_v2 = vpop.eup %2746  ;;  %2766 = vrcp.f32 %v1676_v54  ;;  %v1614_v61 = vmul.f32 1.442695, %v2185_v60  ;;  %v1837_v62 = vmul.f32 %v2906_v44, %v2745_v0 }
 0x44e   : > { %v2749_v32 = vpop.eup %2748  ;;  %2768 = vrcp.f32 %v1679_v20  ;;  %v1691_v19 = vadd.f32 1.0, %v2747_v2  ;;  %v1394_v21 = vpop.xlane.xlu1 %1393  ;;  %v2910_v20 = vld [vmem:[%s3950_s2 + $0x98] sm:$0xff] }
 0x44f   : > { %v2751_v57 = vpop.eup %2750  ;;  %2770 = vpow2.f32 %v1614_v61  ;;  %v2187_v23 = vmul.f32 -10.0, %v1394_v21  ;;  %v1836_v26 = vmul.f32 %v2905_v25, %v2749_v32  ;;  %v1630_v61 = vmul.f32 1.442695, %v2193_v50  ;;  %v1427_v7 = vpop.xlane.xlu0 %1426 }
 0x450   : > { %v3717_v3 = vpop.eup %2752  ;;  %2772 = vrcp.f32 %v1678_v17  ;;  %v1680_v24 = vadd.f32 1.0, %v2751_v57  ;;  %v2524_v21 = vpack.c.bf16 %v1823_v36, %v1822_v28  ;;  %v1598_v25 = vmul.f32 1.442695, %v2177_v59 }
 0x451   : > { %v2755_v34 = vpop.eup %2754  ;;  %2774 = vpow2.f32 %v1596_v35  ;;  %v1618_v13 = vmul.f32 1.442695, %v2187_v23  ;;  %v2518_v31 = vpack.c.bf16 %v1837_v62, %v1836_v26  ;;  %v2196_v23 = vmul.f32 -10.0, %v1421_v22 }
 0x452   : > { %v3724_v12 = vpop.eup %2756  ;;  %2776 = vrcp.f32 %v1691_v19  ;;  %v1690_v38 = vadd.f32 1.0, %v2755_v34  ;;  %v1403_v40 = vpop.xlane.xlu1 %1402  ;;  %v2195_v26 = vmul.f32 -10.0, %v1418_v1  ;;  %v1824_v34 = vmul.f32 %v2912_v33, %v3717_v3  ;;  %v2915_v3 = vld [vmem:[%s3950_s2 + $0x28] sm:$0xff] }
 0x453   : > { %v2759_v43 = vpop.eup %2758  ;;  %2778 = vpow2.f32 %v1618_v13  ;;  %v2190_v4 = vmul.f32 -10.0, %v1403_v40  ;;  %2519 = vmatprep.subr.bf16.mxu1 %v2518_v31  ;;  %v1433_v13 = vpop.xlane.xlu0 %1432  ;;  %v2913_v31 = vld [vmem:[%s3950_s2 + $0xa0] sm:$0xff] }
 0x454   : > { %v2761_v10 = vpop.eup %2760  ;;  %2780 = vrcp.f32 %v1690_v38  ;;  %2521 = vmatpush3.bf16.msra.mxu1 %v2520_v42  ;;  %v1695_v0 = vadd.f32 1.0, %v2759_v43  ;;  %v2914_v38 = vld [vmem:[%s3950_s2 + $0xa8] sm:$0xff]  ;;  %v1636_v43 = vmul.f32 1.442695, %v2196_v23 }
 0x455   : > { %v2763_v53 = vpop.eup %2762  ;;  %2782 = vrcp.f32 %v1681_v11  ;;  %v1624_v8 = vmul.f32 1.442695, %v2190_v4  ;;  %v1839_v49 = vmul.f32 %v2910_v20, %v2761_v10  ;;  %v1825_v4 = vmul.f32 %v2915_v3, %v3706_v55  ;;  %v2916_v55 = vld [vmem:[%s3950_s2 + $0x30] sm:$0xff] }
 0x456   : > { %v2765_v48 = vpop.eup %2764  ;;  %2784 = vrcp.f32 %v1680_v24  ;;  %v1693_v16 = vadd.f32 1.0, %v2763_v53  ;;  %v1400_v46 = vpop.xlane.xlu1 %1399 }
 0x457   : > { %v3730_v51 = vpop.eup %2766  ;;  %2786 = vpow2.f32 %v1624_v8  ;;  %v2189_v54 = vmul.f32 -10.0, %v1400_v46  ;;  %v1838_v39 = vmul.f32 %v2909_v56, %v2765_v48  ;;  %v1439_v28 = vpop.xlane.xlu0 %1438 }
 0x458   : > { %v3738_v14 = vpop.eup %2768  ;;  %2788 = vpow2.f32 %v1600_v47  ;;  %v1634_v47 = vmul.f32 1.442695, %v2195_v26  ;;  %v1826_v56 = vmul.f32 %v2916_v55, %v3730_v51  ;;  %v2918_v51 = vld [vmem:[%s3950_s2 + $0xb0] sm:$0xff] }
 0x459   : > { %v2771_v60 = vpop.eup %2770  ;;  %2790 = vpow2.f32 %v1632_v29  ;;  %v1622_v17 = vmul.f32 1.442695, %v2189_v54  ;;  %v2522_v2 = vpack.c.bf16 %v1839_v49, %v1838_v39  ;;  %v2198_v54 = vmul.f32 -10.0, %v1427_v7 }
 0x45a   : > { %v3745_v35 = vpop.eup %2772  ;;  %2792 = vrcp.f32 %v1693_v16  ;;  %v1692_v32 = vadd.f32 1.0, %v2771_v60  ;;  %v1409_v19 = vpop.xlane.xlu1 %1408  ;;  %v2528_v16 = vpack.c.bf16 %v1825_v4, %v1824_v34  ;;  %v2200_v49 = vmul.f32 -10.0, %v1433_v13  ;;  %v2921_v13 = vld [vmem:[%s3950_s2 + $0xc0] sm:$0xff] }
 0x45b   : > { %v2775_v6 = vpop.eup %2774  ;;  %2794 = vpow2.f32 %v1622_v17  ;;  %v2192_v41 = vmul.f32 -10.0, %v1409_v19  ;;  %2523 = vmatprep.subr.bf16.mxu1 %v2522_v2  ;;  %v2917_v17 = vld [vmem:[%s3950_s2 + $0x38] sm:$0xff]  ;;  %v1445_v7 = vpop.xlane.xlu0 %1444 }
 0x45c   : > { %v2777_v57 = vpop.eup %2776  ;;  %2796 = vrcp.f32 %v1692_v32  ;;  %2525 = vmatpush3.bf16.msra.mxu1 %v2524_v21  ;;  %v1683_v11 = vadd.f32 1.0, %v2775_v6  ;;  %v1827_v2 = vmul.f32 %v2917_v17, %v3724_v12  ;;  %v2919_v21 = vld [vmem:[%s3950_s2 + $0xb8] sm:$0xff]  ;;  %v1644_v12 = vmul.f32 1.442695, %v2200_v49 }
 0x45d   : > { %v2779_v52 = vpop.eup %2778  ;;  %2798 = vrcp.f32 %v1695_v0  ;;  %v1628_v44 = vmul.f32 1.442695, %v2192_v41  ;;  %v1841_v40 = vmul.f32 %v2914_v38, %v2777_v57  ;;  %v1640_v57 = vmul.f32 1.442695, %v2198_v54 }
 0x45e   : > { %v2781_v62 = vpop.eup %2780  ;;  %2800 = vpow2.f32 %v1630_v61  ;;  %v1694_v27 = vadd.f32 1.0, %v2779_v52  ;;  %v1406_v30 = vpop.xlane.xlu1 %1405  ;;  %v2532_v23 = vpack.c.bf16 %v1827_v2, %v1826_v56 }
 0x45f   : > { %v3751_v58 = vpop.eup %2782  ;;  %2802 = vpow2.f32 %v1628_v44  ;;  %v2191_v22 = vmul.f32 -10.0, %v1406_v30  ;;  %v1840_v24 = vmul.f32 %v2913_v31, %v2781_v62  ;;  %v2920_v30 = vld [vmem:[%s3950_s2 + $0x40] sm:$0xff] }
 0x460   : > { %v3759_v42 = vpop.eup %2784  ;;  %2804 = vrcp.f32 %v1694_v27  ;;  %v1828_v33 = vmul.f32 %v2920_v30, %v3745_v35  ;;  %v2923_v35 = vld [vmem:[%s3950_s2 + $0x48] sm:$0xff] }
 0x461   : > { %v2787_v10 = vpop.eup %2786  ;;  %2806 = vpow2.f32 %v1598_v25  ;;  %v1626_v53 = vmul.f32 1.442695, %v2191_v22  ;;  %v2526_v29 = vpack.c.bf16 %v1841_v40, %v1840_v24  ;;  %v2922_v24 = vld [vmem:[%s3950_s2 + $0xc8] sm:$0xff]  ;;  %v1451_v40 = vpop.xlane.xlu0 %1450  ;;  %v1829_v3 = vmul.f32 %v2923_v35, %v3738_v14  ;;  %v2924_v14 = vld [vmem:[%s3950_s2 + $0x50] sm:$0xff] }
 0x462   : > { %v2789_v8 = vpop.eup %2788  ;;  %2808 = vrcp.f32 %v1683_v11  ;;  %v1697_v48 = vadd.f32 1.0, %v2787_v10  ;;  %v1358_v50 = vpop.xlane.xlu1 %1357  ;;  %v2202_v11 = vmul.f32 -10.0, %v1439_v28 }
 0x463   : > { %v2791_v46 = vpop.eup %2790  ;;  %2810 = vpow2.f32 %v1626_v53  ;;  %v2175_v37 = vmul.f32 -10.0, %v1358_v50  ;;  %2527 = vmatprep.subr.bf16.mxu1 %v2526_v29  ;;  %v1685_v20 = vadd.f32 1.0, %v2789_v8 }
 0x464   : > { %v2793_v1 = vpop.eup %2792  ;;  %2812 = vpow2.f32 %v1636_v43  ;;  %2529 = vmatpush3.bf16.msra.mxu1 %v2528_v16  ;;  %v1701_v36 = vadd.f32 1.0, %v2791_v46  ;;  %v2536_v16 = vpack.c.bf16 %v1829_v3, %v1828_v33  ;;  %v2928_v3 = vld [vmem:[%s3950_s2 + $0xe0] sm:$0xff] }
 0x465   : > { %v2795_v39 = vpop.eup %2794  ;;  %2814 = vpow2.f32 %v1634_v47  ;;  %v1594_v59 = vmul.f32 1.442695, %v2175_v37  ;;  %v1843_v6 = vmul.f32 %v2919_v21, %v2793_v1  ;;  %v1830_v1 = vmul.f32 %v2924_v14, %v3759_v42  ;;  %v2925_v42 = vld [vmem:[%s3950_s2 + $0xd0] sm:$0xff]  ;;  %v2927_v21 = vld [vmem:[%s3950_s2 + $0x58] sm:$0xff] }
 0x466   : > { %v2797_v15 = vpop.eup %2796  ;;  %2816 = vrcp.f32 %v1697_v48  ;;  %v1696_v60 = vadd.f32 1.0, %v2795_v39  ;;  %v1424_v0 = vpop.xlane.xlu1 %1423  ;;  %v1648_v48 = vmul.f32 1.442695, %v2202_v11  ;;  %v2204_v39 = vmul.f32 -10.0, %v1445_v7 }
 0x467   : > { %v2799_v61 = vpop.eup %2798  ;;  %2818 = vpow2.f32 %v1594_v59  ;;  %v2197_v32 = vmul.f32 -10.0, %v1424_v0  ;;  %v1842_v19 = vmul.f32 %v2918_v51, %v2797_v15 }
 0x468   : > { %v2801_v41 = vpop.eup %2800  ;;  %2820 = vrcp.f32 %v1696_v60  ;;  %v1845_v38 = vmul.f32 %v2922_v24, %v2799_v61  ;;  %v2206_v60 = vmul.f32 -10.0, %v1451_v40  ;;  %v2926_v61 = vld [vmem:[%s3950_s2 + $0xd8] sm:$0xff] }
 0x469   : > { %v2803_v52 = vpop.eup %2802  ;;  %2822 = vrcp.f32 %v1685_v20  ;;  %v1638_v25 = vmul.f32 1.442695, %v2197_v32  ;;  %v2530_v26 = vpack.c.bf16 %v1843_v6, %v1842_v19  ;;  %v1700_v10 = vadd.f32 1.0, %v2801_v41  ;;  %v1457_v20 = vpop.xlane.xlu0 %1456 }
 0x46a   : > { %v2805_v44 = vpop.eup %2804  ;;  %2824 = vrcp.f32 %v1701_v36  ;;  %v1699_v62 = vadd.f32 1.0, %v2803_v52  ;;  %v1430_v27 = vpop.xlane.xlu1 %1429  ;;  %v1831_v6 = vmul.f32 %v2927_v21, %v3751_v58  ;;  %v1652_v41 = vmul.f32 1.442695, %v2204_v39 }
 0x46b   : > { %v2807_v34 = vpop.eup %2806  ;;  %2826 = vpow2.f32 %v1638_v25  ;;  %v2199_v22 = vmul.f32 -10.0, %v1430_v27  ;;  %2531 = vmatprep.subr.bf16.mxu1 %v2530_v26  ;;  %v1844_v31 = vmul.f32 %v2921_v13, %v2805_v44  ;;  %v1656_v25 = vmul.f32 1.442695, %v2206_v60 }
 0x46c   : > { %v3789_v43 = vpop.eup %2808  ;;  %2828 = vpow2.f32 %v1640_v57  ;;  %2533 = vmatpush3.bf16.msra.mxu1 %v2532_v23  ;;  %v1684_v55 = vadd.f32 1.0, %v2807_v34  ;;  %v2540_v44 = vpack.c.bf16 %v1831_v6, %v1830_v1 }
 0x46d   : > { %v2811_v4 = vpop.eup %2810  ;;  %2830 = vpow2.f32 %v1644_v12  ;;  %v1642_v47 = vmul.f32 1.442695, %v2199_v22  ;;  %v2534_v53 = vpack.c.bf16 %v1845_v38, %v1844_v31  ;;  %v1463_v52 = vpop.xlane.xlu0 %1462 }
 0x46e   : > { %v2813_v29 = vpop.eup %2812  ;;  %2832 = vrcp.f32 %v1699_v62  ;;  %v1698_v8 = vadd.f32 1.0, %v2811_v4  ;;  %v1436_v50 = vpop.xlane.xlu1 %1435  ;;  %v2208_v62 = vmul.f32 -10.0, %v1457_v20  ;;  %v2210_v38 = vmul.f32 -10.0, %v1463_v52 }
 0x46f   : > { %v2815_v46 = vpop.eup %2814  ;;  %2834 = vpow2.f32 %v1642_v47  ;;  %v2201_v37 = vmul.f32 -10.0, %v1436_v50  ;;  %2535 = vmatprep.subr.bf16.mxu1 %v2534_v53  ;;  %v1703_v59 = vadd.f32 1.0, %v2813_v29 }
 0x470   : > { %v2817_v28 = vpop.eup %2816  ;;  %2836 = vrcp.f32 %v1698_v8  ;;  %2537 = vmatpush3.bf16.msra.mxu1 %v2536_v16  ;;  %v1702_v19 = vadd.f32 1.0, %v2815_v46  ;;  %v1660_v31 = vmul.f32 1.442695, %v2208_v62  ;;  %v1664_v1 = vmul.f32 1.442695, %v2210_v38 }
 0x471   : > { %v2819_v54 = vpop.eup %2818  ;;  %2838 = vrcp.f32 %v1700_v10  ;;  %v1646_v56 = vmul.f32 1.442695, %v2201_v37  ;;  %v1847_v32 = vmul.f32 %v2926_v61, %v2817_v28  ;;  %v2929_v10 = vld [vmem:[%s3950_s2 + $0xe8] sm:$0xff]  ;;  %v1469_v53 = vpop.xlane.xlu0 %1468  ;;  %v3016_v38 = vmov 0.0|0.0  }
 0x472   : > { %v2821_v49 = vpop.eup %2820  ;;  %v1682_v15 = vadd.f32 1.0, %v2819_v54  ;;  %2840 = vpow2.f32 %v1648_v48  ;;  %v1442_v36 = vpop.xlane.xlu1 %1441  ;;  %v2930_v48 = vld [vmem:[%s3950_s2 + $0xf8] sm:$0xff]  ;;  %v2212_v39 = vmul.f32 -10.0, %v1469_v53 }
 0x473   : > { %v3799_v0 = vpop.eup %2822  ;;  %2842 = vpow2.f32 %v1646_v56  ;;  %v2203_v17 = vmul.f32 -10.0, %v1442_v36  ;;  %v1846_v2 = vmul.f32 %v2925_v42, %v2821_v49  ;;  %v2933_v36 = vld [vmem:[%s3950_s2 + $0x68] sm:$0xff] }
 0x474   : > { %v2825_v51 = vpop.eup %2824  ;;  %2844 = vrcp.f32 %v1682_v15  ;;  %v1833_v60 = vmul.f32 %v2933_v36, %v3789_v43  ;;  %v2935_v43 = vld [vmem:[%s3950_s2 + $0x70] sm:$0xff] }
 0x475   : > { %v2827_v7 = vpop.eup %2826  ;;  %2846 = vrcp.f32 %v1684_v55  ;;  %v1650_v57 = vmul.f32 1.442695, %v2203_v17  ;;  %v2538_v23 = vpack.c.bf16 %v1847_v32, %v1846_v2  ;;  %v1851_v50 = vmul.f32 %v2930_v48, %v2825_v51  ;;  %v2931_v55 = vld [vmem:[%s3950_s2 + $0xf0] sm:$0xff]  ;;  %v2934_v2 = vld [vmem:[%s3950_s2 + $0x78] sm:$0xff] }
 0x476   : > { %v2829_v12 = vpop.eup %2828  ;;  %2848 = vrcp.f32 %v1703_v59  ;;  %v1448_v26 = vpop.xlane.xlu1 %1447  ;;  %v1704_v33 = vadd.f32 1.0, %v2827_v7  ;;  %v2932_v59 = vld [vmem:[%s3950_s2 + $0x60] sm:$0xff]  ;;  %v1835_v61 = vmul.f32 %v2934_v2, %v3799_v0 }
 0x477   : > { %v2831_v11 = vpop.eup %2830  ;;  %2850 = vpow2.f32 %v1650_v57  ;;  %v2205_v27 = vmul.f32 -10.0, %v1448_v26  ;;  %2539 = vmatprep.subr.bf16.mxu1 %v2538_v23  ;;  %v1705_v34 = vadd.f32 1.0, %v2829_v12 }
 0x478   : > { %v2833_v30 = vpop.eup %2832  ;;  %2852 = vrcp.f32 %v1702_v19  ;;  %2541 = vmatpush3.bf16.msra.mxu1 %v2540_v44  ;;  %v1707_v46 = vadd.f32 1.0, %v2831_v11  ;;  %v2936_v11 = vld [vmem:[%s3950_s2 + $0x100] sm:$0xff] }
 0x479   : > { %v2835_v58 = vpop.eup %2834  ;;  %2854 = vpow2.f32 %v1652_v41  ;;  %v1654_v22 = vmul.f32 1.442695, %v2205_v27  ;;  %v1849_v47 = vmul.f32 %v2929_v10, %v2833_v30  ;;  %v1668_v41 = vmul.f32 1.442695, %v2212_v39  ;;  %v2937_v30 = vld [vmem:[%s3950_s2 + $0x108] sm:$0xff] }
 0x47a   : > { %v2837_v13 = vpop.eup %2836  ;;  %2856 = vpow2.f32 %v1656_v25  ;;  %v1454_v24 = vpop.xlane.xlu1 %1453  ;;  %v1706_v8 = vadd.f32 1.0, %v2835_v58 }
 0x47b   : > { %v2839_v40 = vpop.eup %2838  ;;  %2858 = vpow2.f32 %v1654_v22  ;;  %v2207_v35 = vmul.f32 -10.0, %v1454_v24  ;;  %v1848_v4 = vmul.f32 %v2928_v3, %v2837_v13  ;;  %v2938_v3 = vld [vmem:[%s3950_s2 + $0x110] sm:$0xff] }
 0x47c   : > { %v2841_v29 = vpop.eup %2840  ;;  %2860 = vrcp.f32 %v1704_v33  ;;  %v1850_v56 = vmul.f32 %v2931_v55, %v2839_v40 }
 0x47d   : > { %v2843_v16 = vpop.eup %2842  ;;  %2862 = vrcp.f32 %v1705_v34  ;;  %v1658_v37 = vmul.f32 1.442695, %v2207_v35  ;;  %v2542_v28 = vpack.c.bf16 %v1849_v47, %v1848_v4  ;;  %v1709_v51 = vadd.f32 1.0, %v2841_v29  ;;  %v2939_v29 = vld [vmem:[%s3950_s2 + $0x118] sm:$0xff] }
 0x47e   : > { %v2845_v14 = vpop.eup %2844  ;;  %2864 = vpow2.f32 %v1660_v31  ;;  %v1460_v54 = vpop.xlane.xlu1 %1459  ;;  %v1708_v42 = vadd.f32 1.0, %v2843_v16  ;;  %v2546_v7 = vpack.c.bf16 %v1851_v50, %v1850_v56 }
 0x47f   : > { %v2847_v20 = vpop.eup %2846  ;;  %2866 = vpow2.f32 %v1658_v37  ;;  %2543 = vmatprep.subr.bf16.mxu1 %v2542_v28  ;;  %v2209_v49 = vmul.f32 -10.0, %v1460_v54  ;;  %v1832_v15 = vmul.f32 %v2932_v59, %v2845_v14 }
 0x480   : > { %v2849_v17 = vpop.eup %2848  ;;  %2868 = vrcp.f32 %v1706_v8  ;;  %v1834_v23 = vmul.f32 %v2935_v43, %v2847_v20  ;;  %v2946_v43 = vld [vmem:[%s3950_s2 + $0x150] sm:$0xff] }
 0x481   : > { %v2851_v32 = vpop.eup %2850  ;;  %2870 = vrcp.f32 %v1707_v46  ;;  %v1662_v19 = vmul.f32 1.442695, %v2209_v49  ;;  %v2544_v21 = vpack.c.bf16 %v1833_v60, %v1832_v15  ;;  %v1853_v33 = vmul.f32 %v2937_v30, %v2849_v17  ;;  %v2942_v49 = vld [vmem:[%s3950_s2 + $0x130] sm:$0xff]  ;;  %v2943_v60 = vld [vmem:[%s3950_s2 + $0x138] sm:$0xff] }
 0x482   : > { %v2853_v6 = vpop.eup %2852  ;;  %2872 = vpow2.f32 %v1664_v1  ;;  %v1466_v57 = vpop.xlane.xlu1 %1465  ;;  %v1710_v25 = vadd.f32 1.0, %v2851_v32  ;;  %v2548_v26 = vpack.c.bf16 %v1835_v61, %v1834_v23 }
 0x483   : > { %v2855_v52 = vpop.eup %2854  ;;  %2874 = vpow2.f32 %v1662_v19  ;;  %2545 = vmatpush3.bf16.msra.mxu1 %v2544_v21  ;;  %v2211_v12 = vmul.f32 -10.0, %v1466_v57  ;;  %v1852_v27 = vmul.f32 %v2936_v11, %v2853_v6  ;;  %v2945_v6 = vld [vmem:[%s3950_s2 + $0x148] sm:$0xff] }
 0x484   : > { %v2857_v0 = vpop.eup %2856  ;;  %2876 = vrcp.f32 %v1708_v42  ;;  %2547 = vmatprep.subr.bf16.mxu1 %v2546_v7  ;;  %v1711_v34 = vadd.f32 1.0, %v2855_v52  ;;  %v2947_v52 = vld [vmem:[%s3950_s2 + $0x158] sm:$0xff]  ;;  %v2949_v11 = vld [vmem:[%s3950_s2 + $0x168] sm:$0xff] }
 0x485   : > { %v2859_v44 = vpop.eup %2858  ;;  %2878 = vrcp.f32 %v1709_v51  ;;  %v1666_v62 = vmul.f32 1.442695, %v2211_v12  ;;  %v1713_v13 = vadd.f32 1.0, %v2857_v0  ;;  %v2551_v35 = vpack.c.bf16 %v1853_v33, %v1852_v27  ;;  %v2944_v51 = vld [vmem:[%s3950_s2 + $0x140] sm:$0xff] }
 0x486   : > { %v2861_v58 = vpop.eup %2860  ;;  %2880 = vpow2.f32 %v1668_v41  ;;  %v1712_v24 = vadd.f32 1.0, %v2859_v44  ;;  %v2948_v44 = vld [vmem:[%s3950_s2 + $0x160] sm:$0xff] }
 0x487   : > { %v2863_v22 = vpop.eup %2862  ;;  %2882 = vpow2.f32 %v1666_v62  ;;  %2549 = vmatpush3.bf16.msra.mxu1 %v2548_v26  ;;  %v1854_v4 = vmul.f32 %v2938_v3, %v2861_v58 }
 0x488   : > { %v2865_v31 = vpop.eup %2864  ;;  %2884 = vrcp.f32 %v1710_v25  ;;  %2550 = vmatprep.subr.bf16.mxu1 %v3016_v38  ;;  %v1855_v8 = vmul.f32 %v2939_v29, %v2863_v22 }
 0x489   : > { %v2867_v40 = vpop.eup %2866  ;;  %2886 = vrcp.f32 %v1711_v34  ;;  %v1715_v53 = vadd.f32 1.0, %v2865_v31  ;;  %v2950_v34 = vld [vmem:[%s3950_s2 + $0x170] sm:$0xff] }
 0x48a   : > { %v2869_v10 = vpop.eup %2868  ;;  %2214 = vmatmul.mubr.msk.f32.vlgmr.msra.gmra.mrb[0].mxu1 %vm659_vm10, %v3015_v5  ;;  %2888 = vrcp.f32 %v1713_v13  ;;  %v1714_v50 = vadd.f32 1.0, %v2867_v40  ;;  %v2554_v46 = vpack.c.bf16 %v1855_v8, %v1854_v4  ;;  %v2951_v13 = vld [vmem:[%s3950_s2 + $0x178] sm:$0xff]  ;;  %v2953_v4 = vld [vmem:[%s3950_s2 + $0x188] sm:$0xff] }
 0x48b   : > { %v2871_v47 = vpop.eup %2870  ;;  %2552 = vmatpush1.bf16.msra.mxu1 %v2551_v35  ;;  %2215 = vmatprep.mubr.msk.f32.mxu1 %vm1871_vm15, %v3319_v18  ;;  %2890 = vrcp.f32 %v1712_v24  ;;  %v1856_v37 = vmul.f32 %v2940_v9, %v2869_v10  ;;  %v2941_v18 = vld [vmem:[%s3950_s2 + $0x128] sm:$0xff]  ;;  %v2952_v35 = vld [vmem:[%s3950_s2 + $0x180] sm:$0xff] }
 0x48c   : > { %v2873_v48 = vpop.eup %2872  ;;  %2553 = vmatprep.subr.bf16.mxu1 %v3016_v38  ;;  %2892 = vrcp.f32 %v1715_v53  ;;  %v1857_v54 = vmul.f32 %v2941_v18, %v2871_v47 }
 0x48d   : > { %v2875_v16 = vpop.eup %2874  ;;  %v1717_v1 = vadd.f32 1.0, %v2873_v48  ;;  %2894 = vrcp.f32 %v1714_v50  ;;  %v1870_v48 = vld [vmem:[#allocation2] sm:$0xff] }
 0x48e   : > { %v2877_v28 = vpop.eup %2876  ;;  %v1716_v56 = vadd.f32 1.0, %v2875_v16  ;;  %v2557_v20 = vpack.c.bf16 %v1857_v54, %v1856_v37 }
 0x48f   : > { %v2879_v14 = vpop.eup %2878  ;;  %2555 = vmatpush1.bf16.msra.mxu1 %v2554_v46  ;;  %v1858_v59 = vmul.f32 %v2942_v49, %v2877_v28  ;;  %2896 = vrcp.f32 %v1717_v1 }
 0x490   : > { %v2881_v55 = vpop.eup %2880  ;;  %2556 = vmatprep.subr.bf16.mxu1 %v3016_v38  ;;  %v1859_v17 = vmul.f32 %v2943_v60, %v2879_v14  ;;  %2898 = vrcp.f32 %v1716_v56 }
 0x491   : > { %v2883_v39 = vpop.eup %2882  ;;  %v1719_v36 = vadd.f32 1.0, %v2881_v55 }
 0x492   : > { %v2885_v15 = vpop.eup %2884  ;;  %v1718_v2 = vadd.f32 1.0, %v2883_v39  ;;  %v2560_v32 = vpack.c.bf16 %v1859_v17, %v1858_v59 }
 0x493   : > { %2558 = vmatpush1.bf16.msra.mxu1 %v2557_v20  ;;  %v2887_v42 = vpop.eup %2886  ;;  %v1860_v19 = vmul.f32 %v2944_v51, %v2885_v15  ;;  %2900 = vrcp.f32 %v1719_v36 }
 0x494   : > { %2559 = vmatprep.subr.bf16.mxu1 %v3016_v38  ;;  %v2889_v61 = vpop.eup %2888  ;;  %v1861_v7 = vmul.f32 %v2945_v6, %v2887_v42  ;;  %2902 = vrcp.f32 %v1718_v2 }
 0x495   : > { %v2891_v21 = vpop.eup %2890  ;;  %v1863_v12 = vmul.f32 %v2947_v52, %v2889_v61 }
 0x496   : > { %v2893_v41 = vpop.eup %2892  ;;  %v2563_v57 = vpack.c.bf16 %v1861_v7, %v1860_v19  ;;  %v1862_v23 = vmul.f32 %v2946_v43, %v2891_v21 }
 0x497   : > { %2561 = vmatpush1.bf16.msra.mxu1 %v2560_v32  ;;  %v2895_v0 = vpop.eup %2894  ;;  %v1865_v27 = vmul.f32 %v2949_v11, %v2893_v41 }
 0x498   : > { %2562 = vmatprep.subr.bf16.mxu1 %v3016_v38  ;;  %v2566_v26 = vpack.c.bf16 %v1863_v12, %v1862_v23  ;;  %v1864_v62 = vmul.f32 %v2948_v44, %v2895_v0 }
 0x499   : > { %v2897_v25 = vpop.eup %2896 }
 0x49a   : > { %v2899_v30 = vpop.eup %2898  ;;  %v2569_v58 = vpack.c.bf16 %v1865_v27, %v1864_v62  ;;  %v1867_v31 = vmul.f32 %v2951_v13, %v2897_v25 }
 0x49b   : > { %2564 = vmatpush1.bf16.msra.mxu1 %v2563_v57  ;;  %v1866_v22 = vmul.f32 %v2950_v34, %v2899_v30 }
 0x49c   : > { %2565 = vmatprep.subr.bf16.mxu1 %v3016_v38 }
 0x49d   : > { %v2901_v33 = vpop.eup %2900  ;;  %v2572_v40 = vpack.c.bf16 %v1867_v31, %v1866_v22 }
 0x49e   : > { %v2903_v24 = vpop.eup %2902  ;;  %v1869_v10 = vmul.f32 %v2953_v4, %v2901_v33 }
 0x49f   : > { %2567 = vmatpush1.bf16.msra.mxu1 %v2566_v26  ;;  %v1868_v3 = vmul.f32 %v2952_v35, %v2903_v24 }
 0x4a0   : > { %2568 = vmatprep.subr.bf16.mxu1 %v3016_v38 }
 0x4a1   : > { %v2575_v47 = vpack.c.bf16 %v1869_v10, %v1868_v3 }
 0x4a3   : > { %2570 = vmatpush1.bf16.msra.mxu1 %v2569_v58 }
 0x4a4   : > { %2571 = vmatprep.subr.bf16.mxu1 %v3016_v38 }
 0x4a7   : > { %2573 = vmatpush1.bf16.msra.mxu1 %v2572_v40 }
 0x4a8   : > { %2574 = vmatprep.subr.bf16.mxu1 %v3016_v38 }
 0x4ab   : > { %2576 = vmatpush1.bf16.msra.mxu1 %v2575_v47 }
 0x4ae   : > { %2216 = vmatmul.mubr.msk.f32.vlgmr.msra.gmra.mrb[2].mxu1 %vm661_vm13, %v3015_v5 }
 0x55d   : > { %v2348_v53 = vpop.f32.mrb[0].mxu1 }
 0x55e   : > { %v2349_v29 = vpop.f32.mrb[1].mxu1 }
 0x55f   : > { %v2350_v8 = vadd.f32 %v2349_v29, %v2348_v53 }
 0x581   : > { %v2011_v50 = vpop.f32.mrb[2].mxu1 }
 0x582   : > { %v2012_v16 = vadd.f32 %v2350_v8, %v2011_v50  ;;  %v2013_v46 = vpop.f32.mrb[3].mxu1 }
 0x584   : > { %v2015_v9 = vadd.f32 %v2012_v16, %v1870_v48 }
 0x586   : > { %2016 = vst.msk [vmem:[#allocation2] sm:$0xff] %vm675_vm9, %v2015_v9 }
 0x58d   : > { %v2020_v37 = vld [vmem:[#allocation2] sm:$0xff] }
 0x58e   : > { %2021 = vst.msk [vmem:[#allocation5] sm:$0xff] %vm675_vm9, %v2020_v37 }
 0x58f PF: > { %p3913_p7 = scmp.eq.s32.totalorder %s2092_s18, 1  ;;  %s3017_s5 = smov [#allocation5]  }
 0x590   : > { %s2029_s6 = sshll.u32 %s3017_s5, 4  ;;  %s2030_s6 = int_to_ptr.vmem [resolvable:$true] %s2029_s6 }
 0x591   : > { %s2954_s7 = scalar_lea.vmem %s2030_s6, 128  ;;  %p2961_p11 = scmp.lt.s32.totalorder %s2030_s6, %s2030_s6 }
 0x592   : > { %p2955_p8 = scmp.ne.s32.totalorder %s2030_s6, %s2954_s7  ;;  %p2962_p12 = scmp.lt.s32.totalorder %s2954_s7, %s2954_s7 }
 0x594   : > { %p2956_p9 = pnand %p2955_p8, %p3913_p7  ;;  %p2963_p13 = por %p2962_p12, %p2961_p11 }
 0x596   : > { %p2957_p10 = pneg %p2956_p9 }
 0x598   : > { %p2964_p0 = pnand %p2963_p13, %p2957_p10 }
 0x59a   : > { %2967 = shalt.err (!%p2964_p0)
}
 0x59b   : > { %s2968_s18 = scalar_lea.hbm %s3952_s4, 128 }
 0x59c   : > { %p2969_p1 = scmp.ne.s32.totalorder %s3952_s4, %s2968_s18  ;;  %p2974_p4 = scmp.lt.u32.totalorder %s2968_s18, %s3952_s4 }
 0x59e   : > { %p2970_p2 = pnand %p2969_p1, %p3913_p7 }
 0x5a0   : > { %p2971_p3 = pneg %p2970_p2 }
 0x5a2   : > { %p2976_p5 = pnand %p2974_p4, %p2971_p3 }
 0x5a4   : > { %2979 = shalt.err (!%p2976_p5)
}
 0x5a5   : > { %2578 = dma.vmem_to_hbm [thread:$0]  (%p3913_p7), %s2030_s6, 128, %s3952_s4, [#allocation6]  }
 0x5a6   : > { %2993 = dma.done.wait (%p3913_p7), [#allocation6], 128  }
 0x5a7   : > { %2995 = vsyncadd (%p3913_p7), [#allocation6], 4294967168 }
 0x5a8 PF: > { %s15_s17 = sadd.s32 1, %s3006_s17   ;;  %s3954_s15 = smov %s3002_s16 }
 0x5a9   : > { %p12_p6 = scmp.ge.s32.totalorder %s15_s17, 4   ;;  %s3955_s16 = smov %s3957_s19 }
 0x5ab   :  { %14 = sbr.rel (!%p12_p6) target bundleno = 2 (0x2), region = 86 }
 0x5b2   :  { %2042 = vsyncpa [#allocation6], 1 }
 0x5b3   :  { %2044 = vsyncpa [#allocation6 + $0x1], 1 }

</bundles_post_ra>
